<compile_context>
chip_gen: v7x
topology: tpu7x:2x2x1
jax: 0.10.0
libtpu: 0.0.40
codegen_flags: <defaults>
</compile_context>

<pallas_src>
import functools
import math

import jax
import jax.numpy as jnp
from jax import lax
from jax.experimental import pallas as pl
from jax.experimental.pallas import tpu as pltpu


def _mha_kernel(q_ref, k_ref, v_ref,
                wq_ref, bq_ref, wk_ref, bk_ref, wv_ref, bv_ref,
                wo_ref, bo_ref,
                out_ref, probs_ref,
                *, heads_per_group, d_k, compute_dtype):
    """One grid step == (batch b, query tile qi, head-group g).

    Block views:
      q_ref              : (1, TQ, D)        query tile for batch b
      k_ref, v_ref       : (1, S,  D)        full keys/values for batch b
      wq/wk/wv_ref       : (num_groups, D, G*d_k)   resident (constant index_map)
      bq/bk/bv_ref       : (num_groups, 1, G*d_k)   resident
      wo_ref             : (num_groups, G*d_k, D)   resident row-blocks of Wo^T
      bo_ref             : (1, D)                    resident
      out_ref            : (1, TQ, D)   f32, resident across the group axis
      probs_ref          : (1, G, TQ, S)             per-group probs block
    """
    g = pl.program_id(2)
    last_g = pl.num_programs(2) - 1
    cdt = compute_dtype

    def mm(a, b):
        return jnp.dot(a.astype(cdt), b.astype(cdt),
                       preferred_element_type=jnp.float32)

    def mm_bt(a, b):  # a @ b.T via dot_general (no transpose op)
        return lax.dot_general(a.astype(cdt), b.astype(cdt),
                               (((1,), (1,)), ((), ())),
                               preferred_element_type=jnp.float32)

    q = q_ref[0]                       # (TQ, D)
    k = k_ref[0]                       # (S, D)
    v = v_ref[0]                       # (S, D)

    # Resident weights; pick this group's slab with a dynamic leading-axis load.
    wq = wq_ref[g]                     # (D, G*d_k)   (already carries 1/sqrt(d_k))
    wk = wk_ref[g]
    wv = wv_ref[g]
    wo = wo_ref[g]                     # (G*d_k, D)
    bq = bq_ref[g]                     # (1, G*d_k)
    bk = bk_ref[g]
    bv = bv_ref[g]

    # Wide grouped projections: one (·, D) @ (D, G*d_k) matmul per input.
    Qg = mm(q, wq) + bq                # (TQ, G*d_k), f32
    Kg = mm(k, wk) + bk                # (S,  G*d_k)
    Vg = mm(v, wv) + bv                # (S,  G*d_k)

    # Per-head attention within the group (static unroll, G is small).
    # TODO(synk): optional `mask` argument (mask==0 -> -1e9) not wired in.
    ctx_parts = []
    for j in range(heads_per_group):
        sl = slice(j * d_k, (j + 1) * d_k)
        scores = mm_bt(Qg[:, sl], Kg[:, sl])              # (TQ, S), f32
        m = jnp.max(scores, axis=-1, keepdims=True)
        e = jnp.exp(scores - m)
        l = jnp.sum(e, axis=-1, keepdims=True)
        # Exact reciprocal: user-visible probabilities sum to 1.
        p = e * pl.reciprocal(l, approx=False)            # (TQ, S)
        probs_ref[0, j] = p.astype(probs_ref.dtype)
        ctx_parts.append(mm(p, Vg[:, sl]))                # (TQ, d_k)

    ctx = (jnp.concatenate(ctx_parts, axis=-1)
           if heads_per_group > 1 else ctx_parts[0])      # (TQ, G*d_k)

    # Group contribution to the output projection, accumulated straight into
    # the resident f32 output block (no scratch accumulator).
    contrib = mm(ctx, wo)                                  # (TQ, D), f32

    @pl.when(g == 0)
    def _():
        out_ref[...] = jnp.zeros_like(out_ref)

    out_ref[0] += contrib

    @pl.when(g == last_g)
    def _():
        out_ref[0] = out_ref[0] + bo_ref[...]


def multi_head_attention(Q, K, V, params, *, num_heads, mask=None,
                         compute_dtype=jnp.bfloat16,
                         heads_per_group=None, q_tile=None,
                         probs_dtype=jnp.float32):
    """Pallas MHA forward. Q, K, V: (B, S, D). Returns (output, attn_probs)."""
    if mask is not None:
        # TODO(synk): attention mask (masked_fill(mask==0, -1e9)) not implemented.
        raise NotImplementedError("mask is not supported by this Pallas kernel")

    B, S, D = Q.shape
    assert D % num_heads == 0
    d_k = D // num_heads
    scale = 1.0 / math.sqrt(d_k)

    # ---- head grouping: fill the MXU (256-wide v6e/v7x, 128-wide v5e) ------
    if heads_per_group is None:
        heads_per_group = 1
        for cand in range(1, num_heads + 1):
            if num_heads % cand:
                continue
            if cand * d_k > 512:
                break
            heads_per_group = cand
            if cand * d_k >= 256:
                break
    assert num_heads % heads_per_group == 0
    G = heads_per_group
    Gdk = G * d_k
    num_groups = num_heads // G

    # ---- query tiling: bounds (TQ, S) temporaries + probs block in VMEM ----
    if q_tile is None:
        if S > 256 and S % 256 == 0:
            q_tile = 256
        elif S > 128 and S % 128 == 0:
            q_tile = 128
        else:
            q_tile = S
    assert S % q_tile == 0
    TQ = q_tile
    num_q_tiles = S // TQ

    cdt = compute_dtype

    # ---- weight prep (PyTorch Linear: y = x @ W.T + b, W is (out, in)) -----
    def grouped_in(w):  # (D, D) -> (num_groups, D, G*d_k), head-major columns
        return jnp.transpose(w.T.reshape(D, num_groups, Gdk), (1, 0, 2)).astype(cdt)

    wq_g = grouped_in(params['wq'] * scale)        # fold 1/sqrt(d_k) into Wq
    wk_g = grouped_in(params['wk'])
    wv_g = grouped_in(params['wv'])
    wo_g = params['wo'].T.reshape(num_groups, Gdk, D).astype(cdt)
    bq_g = (params['bq'] * scale).reshape(num_groups, 1, Gdk).astype(jnp.float32)
    bk_g = params['bk'].reshape(num_groups, 1, Gdk).astype(jnp.float32)
    bv_g = params['bv'].reshape(num_groups, 1, Gdk).astype(jnp.float32)
    bo = params['bo'].reshape(1, D).astype(jnp.float32)

    Qc, Kc, Vc = (x.astype(cdt) for x in (Q, K, V))

    # ---- explicit VMEM budget (review: do not rely on default scoped limit) -
    bpe = jnp.dtype(cdt).itemsize
    est = (
        2 * (4 * num_groups * D * Gdk) * bpe              # resident weights (x2 buf)
        + 2 * (3 * num_groups * Gdk + D) * 4              # resident biases
        + 2 * (TQ * D + 2 * S * D) * bpe                  # double-buffered Q/K/V blocks
        + 2 * (TQ * D * 4 + G * TQ * S * jnp.dtype(probs_dtype).itemsize)  # out blocks
        + (3 * S * Gdk + TQ * Gdk + 3 * G * TQ * S + TQ * D) * 4           # temporaries
    )
    vmem_limit = int(min(64 * 2**20, max(32 * 2**20, 1.5 * est)))

    kernel = functools.partial(_mha_kernel, heads_per_group=G, d_k=d_k,
                               compute_dtype=cdt)

    q_blk = lambda b, qi, g: (b, qi, 0)
    kv_blk = lambda b, qi, g: (b, 0, 0)
    const3 = lambda b, qi, g: (0, 0, 0)

    out, probs = pl.pallas_call(
        kernel,
        out_shape=(
            jax.ShapeDtypeStruct((B, S, D), jnp.float32),
            jax.ShapeDtypeStruct((B, num_heads, S, S), probs_dtype),
        ),
        grid_spec=pltpu.PrefetchScalarGridSpec(
            num_scalar_prefetch=0,
            grid=(B, num_q_tiles, num_groups),             # group axis last (reduction)
            in_specs=[
                pl.BlockSpec((1, TQ, D), q_blk),           # Q tile
                pl.BlockSpec((1, S, D), kv_blk),           # K (full, per batch)
                pl.BlockSpec((1, S, D), kv_blk),           # V (full, per batch)
                # Resident weights/biases: full array, constant index_map ->
                # fetched from HBM once, kept in VMEM for the whole grid.
                pl.BlockSpec((num_groups, D, Gdk), const3),    # Wq (scaled)
                pl.BlockSpec((num_groups, 1, Gdk), const3),    # bq (scaled)
                pl.BlockSpec((num_groups, D, Gdk), const3),    # Wk
                pl.BlockSpec((num_groups, 1, Gdk), const3),    # bk
                pl.BlockSpec((num_groups, D, Gdk), const3),    # Wv
                pl.BlockSpec((num_groups, 1, Gdk), const3),    # bv
                pl.BlockSpec((num_groups, Gdk, D), const3),    # Wo
                pl.BlockSpec((1, D), lambda b, qi, g: (0, 0)),  # bo
            ],
            out_specs=[
                # Same block index across the group axis -> resident f32
                # accumulator target for the output projection.
                pl.BlockSpec((1, TQ, D), q_blk),
                # Per-group probs block: G*TQ*S footprint, lane-dense when S
                # is a multiple of 128.
                pl.BlockSpec((1, G, TQ, S), lambda b, qi, g: (b, g, qi, 0)),
            ],
        ),
        compiler_params=pltpu.CompilerParams(
            dimension_semantics=("parallel", "parallel", "arbitrary"),
            vmem_limit_bytes=vmem_limit),
    )(Qc, Kc, Vc, wq_g, bq_g, wk_g, bk_g, wv_g, bv_g, wo_g, bo)
    return out, probs


def _reference_mha(Q, K, V, params, *, num_heads):
    """Pure-JAX reference mirroring the PyTorch module exactly."""
    B, S, D = Q.shape
    d_k = D // num_heads

    def lin(x, w, b):  # PyTorch Linear: x @ W.T + b,  W: (out, in)
        return x @ w.T + b

    def split(x):
        return x.reshape(B, S, num_heads, d_k).transpose(0, 2, 1, 3)

    Qp = split(lin(Q, params['wq'], params['bq']))
    Kp = split(lin(K, params['wk'], params['bk']))
    Vp = split(lin(V, params['wv'], params['bv']))
    scores = jnp.einsum('bhqd,bhkd->bhqk', Qp, Kp) / math.sqrt(d_k)
    probs = jax.nn.softmax(scores, axis=-1)
    ctx = jnp.einsum('bhqk,bhkd->bhqd', probs, Vp)
    ctx = ctx.transpose(0, 2, 1, 3).reshape(B, S, D)
    out = lin(ctx, params['wo'], params['bo'])
    return out, probs


if __name__ == "__main__":
    B, S, D, H = 2, 8, 32, 4   # batch, seq, d_model, num_heads

    key = jax.random.PRNGKey(0)
    keys = jax.random.split(key, 11)

    # Deterministic parameter init (PyTorch-Linear-style uniform bound).
    bound = 1.0 / math.sqrt(D)
    uni = lambda k, shp: jax.random.uniform(k, shp, jnp.float32, -bound, bound)
    params = {
        'wq': uni(keys[0], (D, D)), 'bq': uni(keys[1], (D,)),
        'wk': uni(keys[2], (D, D)), 'bk': uni(keys[3], (D,)),
        'wv': uni(keys[4], (D, D)), 'bv': uni(keys[5], (D,)),
        'wo': uni(keys[6], (D, D)), 'bo': uni(keys[7], (D,)),
    }

    Q = jax.random.normal(keys[8], (B, S, D), jnp.float32)
    K = jax.random.normal(keys[9], (B, S, D), jnp.float32)
    V = jax.random.normal(keys[10], (B, S, D), jnp.float32)

    ref_out, ref_probs = _reference_mha(Q, K, V, params, num_heads=H)

    # Exact-precision path (f32 operands), tight tolerance.
    out, probs = multi_head_attention(Q, K, V, params, num_heads=H,
                                      compute_dtype=jnp.float32)
    jax.block_until_ready((out, probs))
    assert jnp.allclose(out, ref_out, atol=2e-3, rtol=2e-3), "f32 output mismatch"
    assert jnp.allclose(probs, ref_probs, atol=2e-3, rtol=2e-3), "f32 probs mismatch"

    # Default bf16-operand path (MXU-native on v6e/v7x), loose tolerance.
    out_bf, probs_bf = multi_head_attention(Q, K, V, params, num_heads=H)
    jax.block_until_ready((out_bf, probs_bf))
    assert jnp.allclose(out_bf, ref_out, atol=5e-2, rtol=5e-2), "bf16 output mismatch"
    assert jnp.allclose(probs_bf, ref_probs, atol=5e-2, rtol=5e-2), "bf16 probs mismatch"

    print("KERNEL_OK")
</pallas_src>

<mosaic_0001>
module attributes {stable_mosaic.version = 11 : i64} {
  func.func @_mha_kernel(%arg0: i32, %arg1: i32, %arg2: i32, %arg3: memref<1x8x32xf32, #tpu.memory_space<vmem>>, %arg4: memref<1x8x32xf32, #tpu.memory_space<vmem>>, %arg5: memref<1x8x32xf32, #tpu.memory_space<vmem>>, %arg6: memref<1x32x32xf32, #tpu.memory_space<vmem>>, %arg7: memref<1x1x32xf32, #tpu.memory_space<vmem>>, %arg8: memref<1x32x32xf32, #tpu.memory_space<vmem>>, %arg9: memref<1x1x32xf32, #tpu.memory_space<vmem>>, %arg10: memref<1x32x32xf32, #tpu.memory_space<vmem>>, %arg11: memref<1x1x32xf32, #tpu.memory_space<vmem>>, %arg12: memref<1x32x32xf32, #tpu.memory_space<vmem>>, %arg13: memref<1x32xf32, #tpu.memory_space<vmem>>, %arg14: memref<1x8x32xf32, #tpu.memory_space<vmem>>, %arg15: memref<1x4x8x8xf32, #tpu.memory_space<vmem>>) attributes {dimension_semantics = [#tpu.dimension_semantics<parallel>, #tpu.dimension_semantics<parallel>, #tpu.dimension_semantics<arbitrary>], iteration_bounds = array<i64: 2, 1, 1>, scalar_prefetch = 0 : i64, scratch_operands = 0 : i64, tpu.core_type = #tpu.core_type<tc>, window_params = [{transform_indices = @transform_0, window_bounds = array<i64: 1, 8, 32>}, {transform_indices = @transform_1, window_bounds = array<i64: 1, 8, 32>}, {transform_indices = @transform_2, window_bounds = array<i64: 1, 8, 32>}, {pipeline_mode = #tpu.pipeline_mode<synchronous>, transform_indices = @transform_3, window_bounds = array<i64: 1, 32, 32>}, {pipeline_mode = #tpu.pipeline_mode<synchronous>, transform_indices = @transform_4, window_bounds = array<i64: 1, 1, 32>}, {pipeline_mode = #tpu.pipeline_mode<synchronous>, transform_indices = @transform_5, window_bounds = array<i64: 1, 32, 32>}, {pipeline_mode = #tpu.pipeline_mode<synchronous>, transform_indices = @transform_6, window_bounds = array<i64: 1, 1, 32>}, {pipeline_mode = #tpu.pipeline_mode<synchronous>, transform_indices = @transform_7, window_bounds = array<i64: 1, 32, 32>}, {pipeline_mode = #tpu.pipeline_mode<synchronous>, transform_indices = @transform_8, window_bounds = array<i64: 1, 1, 32>}, {pipeline_mode = #tpu.pipeline_mode<synchronous>, transform_indices = @transform_9, window_bounds = array<i64: 1, 32, 32>}, {pipeline_mode = #tpu.pipeline_mode<synchronous>, transform_indices = @transform_10, window_bounds = array<i64: 1, 32>}, {transform_indices = @transform_11, window_bounds = array<i64: 1, 8, 32>}, {transform_indices = @transform_12, window_bounds = array<i64: 1, 4, 8, 8>}]} {
    %c0 = arith.constant 0 : index
    %c0_0 = arith.constant 0 : index
    %c0_1 = arith.constant 0 : index
    %0 = vector.load %arg3[%c0, %c0_0, %c0_1] : memref<1x8x32xf32, #tpu.memory_space<vmem>>, vector<1x8x32xf32>
    %1 = vector.shape_cast %0 : vector<1x8x32xf32> to vector<8x32xf32>
    %c0_2 = arith.constant 0 : index
    %c0_3 = arith.constant 0 : index
    %c0_4 = arith.constant 0 : index
    %2 = vector.load %arg4[%c0_2, %c0_3, %c0_4] : memref<1x8x32xf32, #tpu.memory_space<vmem>>, vector<1x8x32xf32>
    %3 = vector.shape_cast %2 : vector<1x8x32xf32> to vector<8x32xf32>
    %c0_5 = arith.constant 0 : index
    %c0_6 = arith.constant 0 : index
    %c0_7 = arith.constant 0 : index
    %4 = vector.load %arg5[%c0_5, %c0_6, %c0_7] : memref<1x8x32xf32, #tpu.memory_space<vmem>>, vector<1x8x32xf32>
    %5 = vector.shape_cast %4 : vector<1x8x32xf32> to vector<8x32xf32>
    %6 = arith.index_cast %arg2 : i32 to index
    %c0_8 = arith.constant 0 : index
    %c0_9 = arith.constant 0 : index
    %7 = vector.load %arg6[%6, %c0_8, %c0_9] : memref<1x32x32xf32, #tpu.memory_space<vmem>>, vector<1x32x32xf32>
    %8 = vector.shape_cast %7 : vector<1x32x32xf32> to vector<32x32xf32>
    %9 = arith.index_cast %arg2 : i32 to index
    %c0_10 = arith.constant 0 : index
    %c0_11 = arith.constant 0 : index
    %10 = vector.load %arg8[%9, %c0_10, %c0_11] : memref<1x32x32xf32, #tpu.memory_space<vmem>>, vector<1x32x32xf32>
    %11 = vector.shape_cast %10 : vector<1x32x32xf32> to vector<32x32xf32>
    %12 = arith.index_cast %arg2 : i32 to index
    %c0_12 = arith.constant 0 : index
    %c0_13 = arith.constant 0 : index
    %13 = vector.load %arg10[%12, %c0_12, %c0_13] : memref<1x32x32xf32, #tpu.memory_space<vmem>>, vector<1x32x32xf32>
    %14 = vector.shape_cast %13 : vector<1x32x32xf32> to vector<32x32xf32>
    %15 = arith.index_cast %arg2 : i32 to index
    %c0_14 = arith.constant 0 : index
    %c0_15 = arith.constant 0 : index
    %16 = vector.load %arg12[%15, %c0_14, %c0_15] : memref<1x32x32xf32, #tpu.memory_space<vmem>>, vector<1x32x32xf32>
    %17 = vector.shape_cast %16 : vector<1x32x32xf32> to vector<32x32xf32>
    %18 = arith.index_cast %arg2 : i32 to index
    %c0_16 = arith.constant 0 : index
    %c0_17 = arith.constant 0 : index
    %19 = vector.load %arg7[%18, %c0_16, %c0_17] : memref<1x1x32xf32, #tpu.memory_space<vmem>>, vector<1x1x32xf32>
    %20 = vector.shape_cast %19 : vector<1x1x32xf32> to vector<1x32xf32>
    %21 = arith.index_cast %arg2 : i32 to index
    %c0_18 = arith.constant 0 : index
    %c0_19 = arith.constant 0 : index
    %22 = vector.load %arg9[%21, %c0_18, %c0_19] : memref<1x1x32xf32, #tpu.memory_space<vmem>>, vector<1x1x32xf32>
    %23 = vector.shape_cast %22 : vector<1x1x32xf32> to vector<1x32xf32>
    %24 = arith.index_cast %arg2 : i32 to index
    %c0_20 = arith.constant 0 : index
    %c0_21 = arith.constant 0 : index
    %25 = vector.load %arg11[%24, %c0_20, %c0_21] : memref<1x1x32xf32, #tpu.memory_space<vmem>>, vector<1x1x32xf32>
    %26 = vector.shape_cast %25 : vector<1x1x32xf32> to vector<1x32xf32>
    %cst = arith.constant dense<0.000000e+00> : vector<8x32xf32>
    %27 = tpu.matmul %1, %8, %cst {dimension_numbers = #tpu.dot_dimension_numbers<[1], [0], [0], [1], [0, 0, 1, 1], [], []>} : vector<8x32xf32>, vector<32x32xf32>, vector<8x32xf32> -> vector<8x32xf32>
    %28 = vector.broadcast %20 : vector<1x32xf32> to vector<8x32xf32>
    %29 = arith.addf %27, %28 : vector<8x32xf32>
    %cst_22 = arith.constant dense<0.000000e+00> : vector<8x32xf32>
    %30 = tpu.matmul %3, %11, %cst_22 {dimension_numbers = #tpu.dot_dimension_numbers<[1], [0], [0], [1], [0, 0, 1, 1], [], []>} : vector<8x32xf32>, vector<32x32xf32>, vector<8x32xf32> -> vector<8x32xf32>
    %31 = vector.broadcast %23 : vector<1x32xf32> to vector<8x32xf32>
    %32 = arith.addf %30, %31 : vector<8x32xf32>
    %cst_23 = arith.constant dense<0.000000e+00> : vector<8x32xf32>
    %33 = tpu.matmul %5, %14, %cst_23 {dimension_numbers = #tpu.dot_dimension_numbers<[1], [0], [0], [1], [0, 0, 1, 1], [], []>} : vector<8x32xf32>, vector<32x32xf32>, vector<8x32xf32> -> vector<8x32xf32>
    %34 = vector.broadcast %26 : vector<1x32xf32> to vector<8x32xf32>
    %35 = arith.addf %33, %34 : vector<8x32xf32>
    %36 = vector.extract_strided_slice %29 {offsets = [0, 0], sizes = [8, 8], strides = [1, 1]} : vector<8x32xf32> to vector<8x8xf32>
    %37 = vector.extract_strided_slice %32 {offsets = [0, 0], sizes = [8, 8], strides = [1, 1]} : vector<8x32xf32> to vector<8x8xf32>
    %cst_24 = arith.constant dense<0.000000e+00> : vector<8x8xf32>
    %38 = tpu.matmul %36, %37, %cst_24 {dimension_numbers = #tpu.dot_dimension_numbers<[1], [1], [0], [0], [0, 0, 1, 0], [], []>} : vector<8x8xf32>, vector<8x8xf32>, vector<8x8xf32> -> vector<8x8xf32>
    %cst_25 = arith.constant dense<0xFF800000> : vector<8xf32>
    %39 = vector.multi_reduction <maximumf>, %38, %cst_25 [1] : vector<8x8xf32> to vector<8xf32>
    %40 = vector.shape_cast %39 : vector<8xf32> to vector<8x1xf32>
    %41 = vector.broadcast %40 : vector<8x1xf32> to vector<8x8xf32>
    %42 = arith.subf %38, %41 : vector<8x8xf32>
    %43 = math.exp %42 : vector<8x8xf32>
    %cst_26 = arith.constant dense<0.000000e+00> : vector<8xf32>
    %44 = vector.multi_reduction <add>, %43, %cst_26 [1] : vector<8x8xf32> to vector<8xf32>
    %45 = vector.shape_cast %44 : vector<8xf32> to vector<8x1xf32>
    %46 = tpu.reciprocal %45 : vector<8x1xf32> -> vector<8x1xf32>
    %47 = vector.broadcast %46 : vector<8x1xf32> to vector<8x8xf32>
    %48 = arith.mulf %43, %47 : vector<8x8xf32>
    %c0_27 = arith.constant 0 : index
    %c0_28 = arith.constant 0 : index
    %c0_29 = arith.constant 0 : index
    %c0_30 = arith.constant 0 : index
    %49 = vector.load %arg15[%c0_27, %c0_28, %c0_29, %c0_30] : memref<1x4x8x8xf32, #tpu.memory_space<vmem>>, vector<1x1x8x8xf32>
    %50 = vector.shape_cast %49 : vector<1x1x8x8xf32> to vector<8x8xf32>
    %51 = vector.shape_cast %48 : vector<8x8xf32> to vector<1x1x8x8xf32>
    tpu.vector_store %arg15[%c0_27, %c0_28, %c0_29, %c0_30], %51 {strides = array<i32>} : memref<1x4x8x8xf32, #tpu.memory_space<vmem>>, vector<1x1x8x8xf32>,
    %52 = vector.extract_strided_slice %35 {offsets = [0, 0], sizes = [8, 8], strides = [1, 1]} : vector<8x32xf32> to vector<8x8xf32>
    %cst_31 = arith.constant dense<0.000000e+00> : vector<8x8xf32>
    %53 = tpu.matmul %48, %52, %cst_31 {dimension_numbers = #tpu.dot_dimension_numbers<[1], [0], [0], [1], [0, 0, 1, 1], [], []>} : vector<8x8xf32>, vector<8x8xf32>, vector<8x8xf32> -> vector<8x8xf32>
    %54 = vector.extract_strided_slice %29 {offsets = [0, 8], sizes = [8, 8], strides = [1, 1]} : vector<8x32xf32> to vector<8x8xf32>
    %55 = vector.extract_strided_slice %32 {offsets = [0, 8], sizes = [8, 8], strides = [1, 1]} : vector<8x32xf32> to vector<8x8xf32>
    %cst_32 = arith.constant dense<0.000000e+00> : vector<8x8xf32>
    %56 = tpu.matmul %54, %55, %cst_32 {dimension_numbers = #tpu.dot_dimension_numbers<[1], [1], [0], [0], [0, 0, 1, 0], [], []>} : vector<8x8xf32>, vector<8x8xf32>, vector<8x8xf32> -> vector<8x8xf32>
    %cst_33 = arith.constant dense<0xFF800000> : vector<8xf32>
    %57 = vector.multi_reduction <maximumf>, %56, %cst_33 [1] : vector<8x8xf32> to vector<8xf32>
    %58 = vector.shape_cast %57 : vector<8xf32> to vector<8x1xf32>
    %59 = vector.broadcast %58 : vector<8x1xf32> to vector<8x8xf32>
    %60 = arith.subf %56, %59 : vector<8x8xf32>
    %61 = math.exp %60 : vector<8x8xf32>
    %cst_34 = arith.constant dense<0.000000e+00> : vector<8xf32>
    %62 = vector.multi_reduction <add>, %61, %cst_34 [1] : vector<8x8xf32> to vector<8xf32>
    %63 = vector.shape_cast %62 : vector<8xf32> to vector<8x1xf32>
    %64 = tpu.reciprocal %63 : vector<8x1xf32> -> vector<8x1xf32>
    %65 = vector.broadcast %64 : vector<8x1xf32> to vector<8x8xf32>
    %66 = arith.mulf %61, %65 : vector<8x8xf32>
    %c0_35 = arith.constant 0 : index
    %c1 = arith.constant 1 : index
    %c0_36 = arith.constant 0 : index
    %c0_37 = arith.constant 0 : index
    %67 = vector.load %arg15[%c0_35, %c1, %c0_36, %c0_37] : memref<1x4x8x8xf32, #tpu.memory_space<vmem>>, vector<1x1x8x8xf32>
    %68 = vector.shape_cast %67 : vector<1x1x8x8xf32> to vector<8x8xf32>
    %69 = vector.shape_cast %66 : vector<8x8xf32> to vector<1x1x8x8xf32>
    tpu.vector_store %arg15[%c0_35, %c1, %c0_36, %c0_37], %69 {strides = array<i32>} : memref<1x4x8x8xf32, #tpu.memory_space<vmem>>, vector<1x1x8x8xf32>,
    %70 = vector.extract_strided_slice %35 {offsets = [0, 8], sizes = [8, 8], strides = [1, 1]} : vector<8x32xf32> to vector<8x8xf32>
    %cst_38 = arith.constant dense<0.000000e+00> : vector<8x8xf32>
    %71 = tpu.matmul %66, %70, %cst_38 {dimension_numbers = #tpu.dot_dimension_numbers<[1], [0], [0], [1], [0, 0, 1, 1], [], []>} : vector<8x8xf32>, vector<8x8xf32>, vector<8x8xf32> -> vector<8x8xf32>
    %72 = vector.extract_strided_slice %29 {offsets = [0, 16], sizes = [8, 8], strides = [1, 1]} : vector<8x32xf32> to vector<8x8xf32>
    %73 = vector.extract_strided_slice %32 {offsets = [0, 16], sizes = [8, 8], strides = [1, 1]} : vector<8x32xf32> to vector<8x8xf32>
    %cst_39 = arith.constant dense<0.000000e+00> : vector<8x8xf32>
    %74 = tpu.matmul %72, %73, %cst_39 {dimension_numbers = #tpu.dot_dimension_numbers<[1], [1], [0], [0], [0, 0, 1, 0], [], []>} : vector<8x8xf32>, vector<8x8xf32>, vector<8x8xf32> -> vector<8x8xf32>
    %cst_40 = arith.constant dense<0xFF800000> : vector<8xf32>
    %75 = vector.multi_reduction <maximumf>, %74, %cst_40 [1] : vector<8x8xf32> to vector<8xf32>
    %76 = vector.shape_cast %75 : vector<8xf32> to vector<8x1xf32>
    %77 = vector.broadcast %76 : vector<8x1xf32> to vector<8x8xf32>
    %78 = arith.subf %74, %77 : vector<8x8xf32>
    %79 = math.exp %78 : vector<8x8xf32>
    %cst_41 = arith.constant dense<0.000000e+00> : vector<8xf32>
    %80 = vector.multi_reduction <add>, %79, %cst_41 [1] : vector<8x8xf32> to vector<8xf32>
    %81 = vector.shape_cast %80 : vector<8xf32> to vector<8x1xf32>
    %82 = tpu.reciprocal %81 : vector<8x1xf32> -> vector<8x1xf32>
    %83 = vector.broadcast %82 : vector<8x1xf32> to vector<8x8xf32>
    %84 = arith.mulf %79, %83 : vector<8x8xf32>
    %c0_42 = arith.constant 0 : index
    %c2 = arith.constant 2 : index
    %c0_43 = arith.constant 0 : index
    %c0_44 = arith.constant 0 : index
    %85 = vector.load %arg15[%c0_42, %c2, %c0_43, %c0_44] : memref<1x4x8x8xf32, #tpu.memory_space<vmem>>, vector<1x1x8x8xf32>
    %86 = vector.shape_cast %85 : vector<1x1x8x8xf32> to vector<8x8xf32>
    %87 = vector.shape_cast %84 : vector<8x8xf32> to vector<1x1x8x8xf32>
    tpu.vector_store %arg15[%c0_42, %c2, %c0_43, %c0_44], %87 {strides = array<i32>} : memref<1x4x8x8xf32, #tpu.memory_space<vmem>>, vector<1x1x8x8xf32>,
    %88 = vector.extract_strided_slice %35 {offsets = [0, 16], sizes = [8, 8], strides = [1, 1]} : vector<8x32xf32> to vector<8x8xf32>
    %cst_45 = arith.constant dense<0.000000e+00> : vector<8x8xf32>
    %89 = tpu.matmul %84, %88, %cst_45 {dimension_numbers = #tpu.dot_dimension_numbers<[1], [0], [0], [1], [0, 0, 1, 1], [], []>} : vector<8x8xf32>, vector<8x8xf32>, vector<8x8xf32> -> vector<8x8xf32>
    %90 = vector.extract_strided_slice %29 {offsets = [0, 24], sizes = [8, 8], strides = [1, 1]} : vector<8x32xf32> to vector<8x8xf32>
    %91 = vector.extract_strided_slice %32 {offsets = [0, 24], sizes = [8, 8], strides = [1, 1]} : vector<8x32xf32> to vector<8x8xf32>
    %cst_46 = arith.constant dense<0.000000e+00> : vector<8x8xf32>
    %92 = tpu.matmul %90, %91, %cst_46 {dimension_numbers = #tpu.dot_dimension_numbers<[1], [1], [0], [0], [0, 0, 1, 0], [], []>} : vector<8x8xf32>, vector<8x8xf32>, vector<8x8xf32> -> vector<8x8xf32>
    %cst_47 = arith.constant dense<0xFF800000> : vector<8xf32>
    %93 = vector.multi_reduction <maximumf>, %92, %cst_47 [1] : vector<8x8xf32> to vector<8xf32>
    %94 = vector.shape_cast %93 : vector<8xf32> to vector<8x1xf32>
    %95 = vector.broadcast %94 : vector<8x1xf32> to vector<8x8xf32>
    %96 = arith.subf %92, %95 : vector<8x8xf32>
    %97 = math.exp %96 : vector<8x8xf32>
    %cst_48 = arith.constant dense<0.000000e+00> : vector<8xf32>
    %98 = vector.multi_reduction <add>, %97, %cst_48 [1] : vector<8x8xf32> to vector<8xf32>
    %99 = vector.shape_cast %98 : vector<8xf32> to vector<8x1xf32>
    %100 = tpu.reciprocal %99 : vector<8x1xf32> -> vector<8x1xf32>
    %101 = vector.broadcast %100 : vector<8x1xf32> to vector<8x8xf32>
    %102 = arith.mulf %97, %101 : vector<8x8xf32>
    %c0_49 = arith.constant 0 : index
    %c3 = arith.constant 3 : index
    %c0_50 = arith.constant 0 : index
    %c0_51 = arith.constant 0 : index
    %103 = vector.load %arg15[%c0_49, %c3, %c0_50, %c0_51] : memref<1x4x8x8xf32, #tpu.memory_space<vmem>>, vector<1x1x8x8xf32>
    %104 = vector.shape_cast %103 : vector<1x1x8x8xf32> to vector<8x8xf32>
    %105 = vector.shape_cast %102 : vector<8x8xf32> to vector<1x1x8x8xf32>
    tpu.vector_store %arg15[%c0_49, %c3, %c0_50, %c0_51], %105 {strides = array<i32>} : memref<1x4x8x8xf32, #tpu.memory_space<vmem>>, vector<1x1x8x8xf32>,
    %106 = vector.extract_strided_slice %35 {offsets = [0, 24], sizes = [8, 8], strides = [1, 1]} : vector<8x32xf32> to vector<8x8xf32>
    %cst_52 = arith.constant dense<0.000000e+00> : vector<8x8xf32>
    %107 = tpu.matmul %102, %106, %cst_52 {dimension_numbers = #tpu.dot_dimension_numbers<[1], [0], [0], [1], [0, 0, 1, 1], [], []>} : vector<8x8xf32>, vector<8x8xf32>, vector<8x8xf32> -> vector<8x8xf32>
    %108 = tpu.concatenate %53, %71, %89, %107 in 1 : vector<8x8xf32>, vector<8x8xf32>, vector<8x8xf32>, vector<8x8xf32> -> vector<8x32xf32>
    %cst_53 = arith.constant dense<0.000000e+00> : vector<8x32xf32>
    %109 = tpu.matmul %108, %17, %cst_53 {dimension_numbers = #tpu.dot_dimension_numbers<[1], [0], [0], [1], [0, 0, 1, 1], [], []>} : vector<8x32xf32>, vector<32x32xf32>, vector<8x32xf32> -> vector<8x32xf32>
    %c0_i32 = arith.constant 0 : i32
    %110 = arith.cmpi eq, %arg2, %c0_i32 : i32
    %111 = arith.extui %110 : i1 to i32
    %c0_i32_54 = arith.constant 0 : i32
    %112 = arith.cmpi ne, %111, %c0_i32_54 : i32
    scf.if %112 {
      %cst_63 = arith.constant 0.000000e+00 : f32
      %122 = vector.broadcast %cst_63 : f32 to vector<1x8x32xf32>
      %c0_64 = arith.constant 0 : index
      %c0_65 = arith.constant 0 : index
      %c0_66 = arith.constant 0 : index
      %123 = vector.load %arg14[%c0_64, %c0_65, %c0_66] : memref<1x8x32xf32, #tpu.memory_space<vmem>>, vector<1x8x32xf32>
      tpu.vector_store %arg14[%c0_64, %c0_65, %c0_66], %122 {strides = array<i32>} : memref<1x8x32xf32, #tpu.memory_space<vmem>>, vector<1x8x32xf32>,
    } else {
    }
    %c0_55 = arith.constant 0 : index
    %c0_56 = arith.constant 0 : index
    %c0_57 = arith.constant 0 : index
    %113 = vector.load %arg14[%c0_55, %c0_56, %c0_57] : memref<1x8x32xf32, #tpu.memory_space<vmem>>, vector<1x8x32xf32>
    %114 = vector.shape_cast %113 : vector<1x8x32xf32> to vector<8x32xf32>
    %115 = arith.addf %114, %109 : vector<8x32xf32>
    %c0_58 = arith.constant 0 : index
    %c0_59 = arith.constant 0 : index
    %c0_60 = arith.constant 0 : index
    %116 = vector.load %arg14[%c0_58, %c0_59, %c0_60] : memref<1x8x32xf32, #tpu.memory_space<vmem>>, vector<1x8x32xf32>
    %117 = vector.shape_cast %116 : vector<1x8x32xf32> to vector<8x32xf32>
    %118 = vector.shape_cast %115 : vector<8x32xf32> to vector<1x8x32xf32>
    tpu.vector_store %arg14[%c0_58, %c0_59, %c0_60], %118 {strides = array<i32>} : memref<1x8x32xf32, #tpu.memory_space<vmem>>, vector<1x8x32xf32>,
    %c0_i32_61 = arith.constant 0 : i32
    %119 = arith.cmpi eq, %arg2, %c0_i32_61 : i32
    %120 = arith.extui %119 : i1 to i32
    %c0_i32_62 = arith.constant 0 : i32
    %121 = arith.cmpi ne, %120, %c0_i32_62 : i32
    scf.if %121 {
      %c0_63 = arith.constant 0 : index
      %c0_64 = arith.constant 0 : index
      %c0_65 = arith.constant 0 : index
      %122 = vector.load %arg14[%c0_63, %c0_64, %c0_65] : memref<1x8x32xf32, #tpu.memory_space<vmem>>, vector<1x8x32xf32>
      %123 = vector.shape_cast %122 : vector<1x8x32xf32> to vector<8x32xf32>
      %c0_66 = arith.constant 0 : index
      %c0_67 = arith.constant 0 : index
      %124 = vector.load %arg13[%c0_66, %c0_67] : memref<1x32xf32, #tpu.memory_space<vmem>>, vector<1x32xf32>
      %125 = vector.broadcast %124 : vector<1x32xf32> to vector<8x32xf32>
      %126 = arith.addf %123, %125 : vector<8x32xf32>
      %c0_68 = arith.constant 0 : index
      %c0_69 = arith.constant 0 : index
      %c0_70 = arith.constant 0 : index
      %127 = vector.load %arg14[%c0_68, %c0_69, %c0_70] : memref<1x8x32xf32, #tpu.memory_space<vmem>>, vector<1x8x32xf32>
      %128 = vector.shape_cast %127 : vector<1x8x32xf32> to vector<8x32xf32>
      %129 = vector.shape_cast %126 : vector<8x32xf32> to vector<1x8x32xf32>
      tpu.vector_store %arg14[%c0_68, %c0_69, %c0_70], %129 {strides = array<i32>} : memref<1x8x32xf32, #tpu.memory_space<vmem>>, vector<1x8x32xf32>,
    } else {
    }
    return
  }
  func.func @transform_0(%arg0: i32, %arg1: i32, %arg2: i32) -> (i32, i32, i32) {
    %c0_i32 = arith.constant 0 : i32
    %c0_i32_0 = arith.constant 0 : i32
    return %arg0, %arg1, %c0_i32 : i32, i32, i32
  }
  func.func @transform_1(%arg0: i32, %arg1: i32, %arg2: i32) -> (i32, i32, i32) {
    %c0_i32 = arith.constant 0 : i32
    %c0_i32_0 = arith.constant 0 : i32
    %c0_i32_1 = arith.constant 0 : i32
    return %arg0, %c0_i32, %c0_i32_0 : i32, i32, i32
  }
  func.func @transform_2(%arg0: i32, %arg1: i32, %arg2: i32) -> (i32, i32, i32) {
    %c0_i32 = arith.constant 0 : i32
    %c0_i32_0 = arith.constant 0 : i32
    %c0_i32_1 = arith.constant 0 : i32
    return %arg0, %c0_i32, %c0_i32_0 : i32, i32, i32
  }
  func.func @transform_3(%arg0: i32, %arg1: i32, %arg2: i32) -> (i32, i32, i32) {
    %c0_i32 = arith.constant 0 : i32
    %c0_i32_0 = arith.constant 0 : i32
    %c0_i32_1 = arith.constant 0 : i32
    %c0_i32_2 = arith.constant 0 : i32
    return %c0_i32, %c0_i32_0, %c0_i32_1 : i32, i32, i32
  }
  func.func @transform_4(%arg0: i32, %arg1: i32, %arg2: i32) -> (i32, i32, i32) {
    %c0_i32 = arith.constant 0 : i32
    %c0_i32_0 = arith.constant 0 : i32
    %c0_i32_1 = arith.constant 0 : i32
    %c0_i32_2 = arith.constant 0 : i32
    return %c0_i32, %c0_i32_0, %c0_i32_1 : i32, i32, i32
  }
  func.func @transform_5(%arg0: i32, %arg1: i32, %arg2: i32) -> (i32, i32, i32) {
    %c0_i32 = arith.constant 0 : i32
    %c0_i32_0 = arith.constant 0 : i32
    %c0_i32_1 = arith.constant 0 : i32
    %c0_i32_2 = arith.constant 0 : i32
    return %c0_i32, %c0_i32_0, %c0_i32_1 : i32, i32, i32
  }
  func.func @transform_6(%arg0: i32, %arg1: i32, %arg2: i32) -> (i32, i32, i32) {
    %c0_i32 = arith.constant 0 : i32
    %c0_i32_0 = arith.constant 0 : i32
    %c0_i32_1 = arith.constant 0 : i32
    %c0_i32_2 = arith.constant 0 : i32
    return %c0_i32, %c0_i32_0, %c0_i32_1 : i32, i32, i32
  }
  func.func @transform_7(%arg0: i32, %arg1: i32, %arg2: i32) -> (i32, i32, i32) {
    %c0_i32 = arith.constant 0 : i32
    %c0_i32_0 = arith.constant 0 : i32
    %c0_i32_1 = arith.constant 0 : i32
    %c0_i32_2 = arith.constant 0 : i32
    return %c0_i32, %c0_i32_0, %c0_i32_1 : i32, i32, i32
  }
  func.func @transform_8(%arg0: i32, %arg1: i32, %arg2: i32) -> (i32, i32, i32) {
    %c0_i32 = arith.constant 0 : i32
    %c0_i32_0 = arith.constant 0 : i32
    %c0_i32_1 = arith.constant 0 : i32
    %c0_i32_2 = arith.constant 0 : i32
    return %c0_i32, %c0_i32_0, %c0_i32_1 : i32, i32, i32
  }
  func.func @transform_9(%arg0: i32, %arg1: i32, %arg2: i32) -> (i32, i32, i32) {
    %c0_i32 = arith.constant 0 : i32
    %c0_i32_0 = arith.constant 0 : i32
    %c0_i32_1 = arith.constant 0 : i32
    %c0_i32_2 = arith.constant 0 : i32
    return %c0_i32, %c0_i32_0, %c0_i32_1 : i32, i32, i32
  }
  func.func @transform_10(%arg0: i32, %arg1: i32, %arg2: i32) -> (i32, i32) {
    %c0_i32 = arith.constant 0 : i32
    %c0_i32_0 = arith.constant 0 : i32
    %c0_i32_1 = arith.constant 0 : i32
    return %c0_i32, %c0_i32_0 : i32, i32
  }
  func.func @transform_11(%arg0: i32, %arg1: i32, %arg2: i32) -> (i32, i32, i32) {
    %c0_i32 = arith.constant 0 : i32
    %c0_i32_0 = arith.constant 0 : i32
    return %arg0, %arg1, %c0_i32 : i32, i32, i32
  }
  func.func @transform_12(%arg0: i32, %arg1: i32, %arg2: i32) -> (i32, i32, i32, i32) {
    %c0_i32 = arith.constant 0 : i32
    %c0_i32_0 = arith.constant 0 : i32
    return %arg0, %arg2, %arg1, %c0_i32 : i32, i32, i32, i32
  }
}

</mosaic_0001>

<bundles_post_ra>
// kernel: tpu_custom_call.1
= control target key start
LH: loop header
LB: loop body
LE: loop exit
PB: predicated region body
PF: predicated region fallthrough
CT: control target
= control target key end

     0   :  { %s3197_s0 = inlined_call_operand.hbm [shape: f32[2,8,32], index: 0, kind: input, shape index: {}]   ;;  %s3198_s1 = inlined_call_operand.hbm [shape: f32[2,8,32], index: 1, kind: input, shape index: {}]   ;;  %s3199_s2 = inlined_call_operand.hbm [shape: f32[2,8,32], index: 2, kind: input, shape index: {}]   ;;  %s3200_s3 = inlined_call_operand.hbm [shape: f32[1,32,32], index: 3, kind: input, shape index: {}]   ;;  %s3201_s4 = inlined_call_operand.vmem [shape: f32[1,1,32], index: 4, kind: input, shape index: {}]   ;;  %s3202_s5 = inlined_call_operand.hbm [shape: f32[1,32,32], index: 5, kind: input, shape index: {}]   ;;  %s3203_s6 = inlined_call_operand.vmem [shape: f32[1,1,32], index: 6, kind: input, shape index: {}]   ;;  %s3204_s7 = inlined_call_operand.hbm [shape: f32[1,32,32], index: 7, kind: input, shape index: {}]   ;;  %s3205_s8 = inlined_call_operand.hbm [shape: f32[1,1,32], index: 8, kind: input, shape index: {}]   ;;  %s3206_s9 = inlined_call_operand.vmem [shape: f32[1,32,32], index: 9, kind: input, shape index: {}]   ;;  %s3207_s10 = inlined_call_operand.vmem [shape: f32[1,32], index: 10, kind: input, shape index: {}]   ;;  %s3208_s11 = inlined_call_operand.hbm [shape: f32[2,8,32], index: 11, kind: output, shape index: {0}]   ;;  %s3209_s12 = inlined_call_operand.hbm [shape: f32[2,4,8,8], index: 12, kind: output, shape index: {1}]  }
   0x1   :  { %3237 = sst [smem:[#allocation31_spill]] %s3198_s1 }
   0x2   :  { %3238 = sst [smem:[#allocation32_spill]] %s3200_s3 }
   0x3   :  { %3239 = sst [smem:[#allocation33_spill]] %s3204_s7 }
   0x4   :  { %3240 = sst [smem:[#allocation34_spill]] %s3206_s9 }
   0x5   :  { %3241 = sst [smem:[#allocation35_spill]] %s3207_s10 }
   0x6   :  { %3242 = sst [smem:[#allocation36_spill]] %s3208_s11 }
   0x7   :  { %3243 = sst [smem:[#allocation37_spill]] %s3209_s12 }
   0x8   :  { %18 = vsyncpa [#allocation3], 0 }
   0x9   :  { %20 = vsyncpa [#allocation3 + $0x1], 0 }
   0xa   :  { %21 = vsyncpa [#allocation6], 0 }
   0xb   :  { %23 = vsyncpa [#allocation6 + $0x1], 0 }
   0xc   :  { %24 = vsyncpa [#allocation9], 0 }
   0xd   :  { %25 = vsyncpa [#allocation12], 0 }
   0xe   :  { %26 = vsyncpa [#allocation4], 0 }
   0xf   :  { %28 = vsyncpa [#allocation4 + $0x1], 0 }
  0x10   :  { %29 = vsyncpa [#allocation16], 0 }
  0x11   :  { %31 = vsyncpa [#allocation16 + $0x1], 0  ;;  %s2650_s21 = smov 0   ;;  %s2652_s22 = smov 0  }
  0x12   :  { %s2654_s23 = smov 0   ;;  %s2656_s24 = smov 0  }
  0x13   :  { %s2658_s25 = smov 0   ;;  %s2660_s26 = smov 0  }
  0x14 LB: > { %3244 = sst [smem:[#allocation23_spill]] %s2542_s21  ;;  %s2681_s27 = sadd.s32 4294967295, %s2562_s26   ;;  %s2562_s26 = sphi %s2660_s26, %s37_s26   ;;  %s2558_s25 = sphi %s2658_s25, %s3293_s25   ;;  %s2554_s24 = sphi %s2656_s24, %s3292_s24   ;;  %s2550_s23 = sphi %s2654_s23, %s3296_s23   ;;  %s2546_s22 = sphi %s2652_s22, %s3295_s22   ;;  %s2542_s21 = sphi %s2650_s21, %s3294_s21  }
  0x15   : > { %3245 = sst [smem:[#allocation24_spill]] %s2554_s24  ;;  %p1891_p0 = scmp.ge.s32.totalorder %s2562_s26, 1 }
  0x16   : > { %3246 = sst [smem:[#allocation25_spill]] %s2558_s25  ;;  %p3221_p1 = scmp.eq.s32.totalorder %s2681_s27, 0 }
  0x17   : > { %3247 = sst [smem:[#allocation26_spill]] %s2562_s26  ;;  %p367_p2 = scmp.lt.s32.totalorder %s2562_s26, 3 }
  0x18   : > { %s2564_s29 = smov [#allocation8]   ;;  %s2565_s14 = smov [#allocation11]  }
  0x19   : > { %p2686_p3 = pnand %p1891_p0, %p367_p2  ;;  %s379_s30 = sshll.u32 %s2564_s29, 4  ;;  %s2690_s30 = int_to_ptr.vmem [resolvable:$true] %s379_s30 }
  0x1a   : > { %s411_s15 = sshll.u32 %s2565_s14, 4  ;;  %s3250_s3 = sld [smem:[#allocation32_spill]]  ;;  %s2701_s15 = int_to_ptr.vmem [resolvable:$true] %s411_s15 }
  0x1b   : > { %s3248_s28 = scalar_select %p2686_p3, 1, 0 }
  0x1c   : > { %p2114_p4 = pneg %p2686_p3 }
  0x1e   : > { %p2697_p6 = pnand %p2114_p4, %p3221_p1 }
  0x20   : > { %s3249_s13 = scalar_select %p2697_p6, 1, 0 }
  0x21   : > { %s2234_s18 = scalar_lea.hbm %s3250_s3, 512  ;;  %p2711_p8 = pneg %p2697_p6 }
  0x22   : > { %p2235_p7 = scmp.ne.s32.totalorder %s3250_s3, %s2234_s18  ;;  %p2241_p11 = scmp.lt.u32.totalorder %s2234_s18, %s3250_s3 }
  0x23   : > { %s3251_s29 = scalar_select %p2711_p8, 1, 0 }
  0x24   : > { %p2237_p9 = pnand %p2711_p8, %p2235_p7 }
  0x26   : > { %p2238_p10 = pneg %p2237_p9 }
  0x28   : > { %p2243_p12 = pnand %p2241_p11, %p2238_p10 }
  0x2a   : > { %2246 = shalt.err (!%p2243_p12)
}
  0x2b   : > { %s2247_s16 = scalar_lea.vmem %s2690_s30, 512  ;;  %p2255_p4 = scmp.lt.s32.totalorder %s2690_s30, %s2690_s30 }
  0x2c   : > { %p2248_p13 = scmp.ne.s32.totalorder %s2690_s30, %s2247_s16  ;;  %p2256_p5 = scmp.lt.s32.totalorder %s2247_s16, %s2247_s16 }
  0x2e   : > { %p2250_p0 = pnand %p2248_p13, %p2711_p8  ;;  %p2257_p7 = por %p2256_p5, %p2255_p4 }
  0x30   : > { %p2251_p2 = pneg %p2250_p0 }
  0x32   : > { %p2258_p9 = pnand %p2257_p7, %p2251_p2 }
  0x34   : > { %2261 = shalt.err (!%p2258_p9)
}
  0x35   : > { %s3214_s17 = smov 128   ;;  %s3215_s11 = smov 8  }
  0x36   : > { %2117 = dma.hbm_to_vmem [thread:$0]  (!%p2697_p6), %s3250_s3, 512, %s2690_s30, [#allocation9], %s3214_s17, %s3214_s17, %s3215_s11  }
  0x37   : > { %s3252_s7 = sld [smem:[#allocation33_spill]] }
  0x3d   : > { %s2262_s16 = scalar_lea.hbm %s3252_s7, 512 }
  0x3e   : > { %p2263_p5 = scmp.ne.s32.totalorder %s3252_s7, %s2262_s16  ;;  %p2269_p12 = scmp.lt.u32.totalorder %s2262_s16, %s3252_s7 }
  0x40   : > { %p2265_p10 = pnand %p2263_p5, %p2711_p8 }
  0x42   : > { %p2266_p11 = pneg %p2265_p10 }
  0x44   : > { %p2271_p13 = pnand %p2269_p12, %p2266_p11 }
  0x46   : > { %2274 = shalt.err (!%p2271_p13)
}
  0x47   : > { %s2275_s30 = scalar_lea.vmem %s2701_s15, 512  ;;  %p2283_p7 = scmp.lt.s32.totalorder %s2701_s15, %s2701_s15 }
  0x48   : > { %p2276_p0 = scmp.ne.s32.totalorder %s2701_s15, %s2275_s30  ;;  %p2284_p9 = scmp.lt.s32.totalorder %s2275_s30, %s2275_s30 }
  0x4a   : > { %p2278_p2 = pnand %p2276_p0, %p2711_p8  ;;  %p2285_p5 = por %p2284_p9, %p2283_p7 }
  0x4c   : > { %p2279_p4 = pneg %p2278_p2 }
  0x4e   : > { %p2286_p10 = pnand %p2285_p5, %p2279_p4 }
  0x50   : > { %2289 = shalt.err (!%p2286_p10)
}
  0x51   : > { %2123 = dma.hbm_to_vmem [thread:$0]  (!%p2697_p6), %s3252_s7, 512, %s2701_s15, [#allocation12], %s3214_s17, %s3214_s17, %s3215_s11  }
  0x52   : > { %s1890_s12 = sadd.s32 4294967294, %s2562_s26   ;;  %s56_s24 = sadd.s32 1, %s2558_s25 }
  0x53   : > { %p58_p11 = scmp.ge.s32.totalorder %s56_s24, 2  ;;  %s65_s18 = sadd.s32 1, %s2550_s23 }
  0x54   : > { %p72_p12 = scmp.ne.s32.totalorder %s2550_s23, %s2546_s22  ;;  %p73_p13 = scmp.eq.s32.totalorder %s2562_s26, 0 }
  0x55   : > { %s3298_s24 = smov (%p58_p11, %s56_s24), 0  ;;  %p78_p2 = scmp.ne.s32.totalorder %s2546_s22, %s2542_s21 }
  0x56   : > { %3253 = sst [smem:[#allocation27_spill]] %s3298_s24  ;;  %p2769_p0 = por %p73_p13, %p72_p12 }
  0x57   : > { %s60_s15 = ssub.s32 %s2558_s25, %s3298_s24  ;;  %p324_p4 = scmp.eq.s32.totalorder %s2681_s27, 1 }
  0x58   : > { %p63_p7 = scmp.eq.s32.totalorder %s60_s15, 0  ;;  %p2780_p9 = por %p3221_p1, %p78_p2 }
  0x59   : > { %p2784_p5 = por %p324_p4, %p72_p12  ;;  %p330_p10 = scmp.eq.s32.totalorder %s1890_s12, 1 }
  0x5a   : > { %s3255_s20 = scalar_select %p2780_p9, 1, 0 }
  0x5b   : > { %s3256_s14 = scalar_select %p2784_p5, 1, 0 }
  0x5c   : > { %s2789_s16 = scalar_select %p63_p7, %s2550_s23, %s65_s18  }
  0x5d   : > { %3257 = sst [smem:[#allocation28_spill]] %s3256_s14  ;;  %p2791_p11 = por %p330_p10, %p78_p2 }
  0x5e   : > { %3258 = sst [smem:[#allocation29_spill]] %s2789_s16  ;;  %p2148_p13 = scmp.lt.s32.totalorder %s2562_s26, 2 }
  0x5f   : > { %s3259_s30 = scalar_select %p2791_p11, 1, 0 }
  0x60   : > { %s3216_s9 = sand.u32 1, %s2550_s23   ;;  %s2798_s10 = sshll.u32 %s2558_s25, 7 }
  0x61   : > { %3260 = sst [smem:[#allocation30_spill]] %s3259_s30  ;;  %s2802_s15 = sshll.u32 %s3216_s9, 3 }
  0x62   : > { %p2806_p12 = pnand %p2148_p13, %p2769_p0  ;;  %s461_s12 = sand.u32 1, %s2562_s26  }
  0x63   : > { %s3262_s1 = sld [smem:[#allocation31_spill]]  ;;  %s465_s7 = scalar_lea.vmem [#allocation5], %s2802_s15 }
  0x64   : > { %s3261_s17 = scalar_select %p2806_p12, 1, 0 }
  0x65   : > { %s472_s9 = sshll.u32 %s465_s7, 4  ;;  %s2820_s19 = scalar_lea.sflag [#allocation6], %s461_s12  ;;  %s2818_s9 = int_to_ptr.vmem [resolvable:$true] %s472_s9 }
  0x66   : > { %p2826_p2 = pneg %p2806_p12 }
  0x68   : > { %s3263_s25 = scalar_select %p2826_p2, 1, 0 }
  0x69   : > { %s2815_s3 = scalar_lea.hbm %s3262_s1, %s2798_s10  ;;  %s2295_s16 = scalar_lea.hbm %s3262_s1, 256 }
  0x6a   : > { %s2290_s24 = scalar_lea.hbm %s2815_s3, 128  ;;  %p2296_p10 = scmp.lt.u32.totalorder %s2815_s3, %s3262_s1 }
  0x6b   : > { %p2291_p0 = scmp.ne.s32.totalorder %s2815_s3, %s2290_s24  ;;  %p2297_p13 = scmp.lt.u32.totalorder %s2295_s16, %s2290_s24 }
  0x6c   : > { %p2299_p11 = scmp.lt.u32.totalorder %s2290_s24, %s2815_s3 }
  0x6d   : > { %p2293_p4 = pnand %p2826_p2, %p2291_p0  ;;  %p2298_p1 = por %p2297_p13, %p2296_p10 }
  0x6f   : > { %p2294_p7 = pneg %p2293_p4  ;;  %p2300_p5 = por %p2299_p11, %p2298_p1 }
  0x71   : > { %p2301_p9 = pnand %p2300_p5, %p2294_p7 }
  0x73   : > { %2304 = shalt.err (!%p2301_p9)
}
  0x74   : > { %s2305_s12 = scalar_lea.vmem %s2818_s9, 128  ;;  %s2568_s11 = smov [#allocation5]  }
  0x75   : > { %p2306_p0 = scmp.ne.s32.totalorder %s2818_s9, %s2305_s12  ;;  %s2310_s18 = sshll.u32 %s2568_s11, 4  ;;  %s2311_s18 = int_to_ptr.vmem [resolvable:$false] %s2310_s18 }
  0x76   : > { %s2312_s26 = scalar_lea.vmem %s2311_s18, 256  ;;  %p2313_p6 = scmp.lt.s32.totalorder %s2818_s9, %s2311_s18 }
  0x77   : > { %p2308_p4 = pnand %p2306_p0, %p2826_p2  ;;  %p2314_p8 = scmp.lt.s32.totalorder %s2312_s26, %s2305_s12 }
  0x79   : > { %p2309_p3 = pneg %p2308_p4  ;;  %p2315_p10 = por %p2314_p8, %p2313_p6 }
  0x7b   : > { %p2316_p13 = pnand %p2315_p10, %p2309_p3 }
  0x7d   : > { %2319 = shalt.err (!%p2316_p13)
}
  0x7e   : > { %2133 = dma.hbm_to_vmem [thread:$0]  (!%p2806_p12), %s2815_s3, 128, %s2818_s9, %s2820_s19  }
  0x7f   : > { %s2569_s24 = smov [#allocation10]   ;;  %s2570_s7 = smov [#allocation13]  }
  0x80   : > { %s395_s16 = sshll.u32 %s2569_s24, 4  ;;  %s425_s1 = sshll.u32 %s2570_s7, 4  ;;  %s396_s16 = int_to_ptr.vmem [resolvable:$true] %s395_s16  ;;  %s426_s1 = int_to_ptr.vmem [resolvable:$true] %s425_s1 }
  0x81   : > { %s2320_s18 = scalar_lea.hbm %s3202_s5, 512  ;;  %p3264_p3 = scmp.ne.s32.totalorder %s3251_s29, 0 }
  0x82   : > { %p2321_p1 = scmp.ne.s32.totalorder %s3202_s5, %s2320_s18  ;;  %p2327_p9 = scmp.lt.u32.totalorder %s2320_s18, %s3202_s5 }
  0x84   : > { %p2323_p6 = pnand %p2321_p1, %p3264_p3 }
  0x86   : > { %p2324_p8 = pneg %p2323_p6 }
  0x88   : > { %p2329_p5 = pnand %p2327_p9, %p2324_p8 }
  0x8a   : > { %2332 = shalt.err (!%p2329_p5)
}
  0x8b   : > { %s2333_s3 = scalar_lea.vmem %s396_s16, 512  ;;  %p2341_p4 = scmp.lt.s32.totalorder %s396_s16, %s396_s16 }
  0x8c   : > { %p2334_p11 = scmp.ne.s32.totalorder %s396_s16, %s2333_s3  ;;  %p2342_p10 = scmp.lt.s32.totalorder %s2333_s3, %s2333_s3 }
  0x8e   : > { %p2336_p7 = pnand %p2334_p11, %p3264_p3  ;;  %p2343_p13 = por %p2342_p10, %p2341_p4 }
  0x90   : > { %p2337_p0 = pneg %p2336_p7 }
  0x92   : > { %p2344_p12 = pnand %p2343_p13, %p2337_p0 }
  0x94   : > { %2347 = shalt.err (!%p2344_p12)
}
  0x95   : > { %p3265_p1 = scmp.ne.s32.totalorder %s3249_s13, 0  ;;  %s3266_s30 = smov 8  }
  0x96   : > { %s3267_s9 = smov 128   ;;  %s2348_s11 = scalar_lea.hbm %s3205_s8, 16 }
  0x97   : > { %2120 = dma.hbm_to_vmem [thread:$0]  (!%p3265_p1), %s3202_s5, 512, %s396_s16, [#allocation9], %s3267_s9, %s3267_s9, %s3266_s30  }
  0x98   : > { %p2349_p6 = scmp.ne.s32.totalorder %s3205_s8, %s2348_s11  ;;  %p2355_p9 = scmp.lt.u32.totalorder %s2348_s11, %s3205_s8 }
  0x9a   : > { %p2351_p12 = pnand %p2349_p6, %p3264_p3 }
  0x9c   : > { %p2352_p8 = pneg %p2351_p12 }
  0x9e   : > { %p2357_p5 = pnand %p2355_p9, %p2352_p8 }
  0xa0   : > { %2360 = shalt.err (!%p2357_p5)
}
  0xa1   : > { %s2361_s21 = scalar_lea.vmem %s426_s1, 16  ;;  %s2368_s16 = scalar_lea.vmem %s426_s1, 32 }
  0xa2   : > { %p2362_p11 = scmp.ne.s32.totalorder %s426_s1, %s2361_s21  ;;  %p2369_p4 = scmp.lt.s32.totalorder %s426_s1, %s426_s1 }
  0xa3   : > { %p2370_p10 = scmp.lt.s32.totalorder %s2368_s16, %s2361_s21 }
  0xa4   : > { %p2364_p7 = pnand %p2362_p11, %p3264_p3 }
  0xa5   : > { %p2371_p13 = por %p2370_p10, %p2369_p4 }
  0xa6   : > { %p2365_p0 = pneg %p2364_p7 }
  0xa8   : > { %p2372_p2 = pnand %p2371_p13, %p2365_p0 }
  0xaa   : > { %2375 = shalt.err (!%p2372_p2)
}
  0xab   : > { %2126 = dma.hbm_to_vmem [thread:$0]  (!%p3265_p1), %s3205_s8, 16, %s426_s1, [#allocation12]  }
  0xac   : > { %s2893_s24 = scalar_lea.hbm %s3197_s0, %s2798_s10  ;;  %s446_s7 = scalar_lea.vmem [#allocation2], %s2802_s15 }
  0xad   : > { %s454_s13 = sshll.u32 %s446_s7, 4  ;;  %s2902_s12 = scalar_lea.hbm %s3199_s2, %s2798_s10  ;;  %s2896_s13 = int_to_ptr.vmem [resolvable:$true] %s454_s13 }
  0xae   : > { %s3268_s26 = sand.u32 1, %s2550_s23   ;;  %s2376_s3 = scalar_lea.hbm %s2893_s24, 128 }
  0xaf   : > { %s443_s1 = scalar_lea.sflag [#allocation3], %s3268_s26  ;;  %p2377_p2 = scmp.ne.s32.totalorder %s2893_s24, %s2376_s3 }
  0xb0   : > { %p3269_p3 = scmp.ne.s32.totalorder %s3263_s25, 0  ;;  %s2381_s30 = scalar_lea.hbm %s3197_s0, 256 }
  0xb1   : > { %p2382_p12 = scmp.lt.u32.totalorder %s2893_s24, %s3197_s0  ;;  %p2383_p8 = scmp.lt.u32.totalorder %s2381_s30, %s2376_s3 }
  0xb2   : > { %p2379_p1 = pnand %p2377_p2, %p3269_p3  ;;  %p2385_p5 = scmp.lt.u32.totalorder %s2376_s3, %s2893_s24 }
  0xb3   : > { %p2384_p9 = por %p2383_p8, %p2382_p12 }
  0xb4   : > { %p2380_p6 = pneg %p2379_p1 }
  0xb5   : > { %p2386_p11 = por %p2385_p5, %p2384_p9 }
  0xb7   : > { %p2387_p7 = pnand %p2386_p11, %p2380_p6 }
  0xb9   : > { %2390 = shalt.err (!%p2387_p7)
}
  0xba   : > { %s2391_s10 = scalar_lea.vmem %s2896_s13, 128  ;;  %s2571_s14 = smov [#allocation2]  }
  0xbb   : > { %p2392_p0 = scmp.ne.s32.totalorder %s2896_s13, %s2391_s10  ;;  %s2396_s7 = sshll.u32 %s2571_s14, 4  ;;  %s2397_s7 = int_to_ptr.vmem [resolvable:$false] %s2396_s7 }
  0xbc   : > { %s2398_s11 = scalar_lea.vmem %s2397_s7, 256  ;;  %p2399_p13 = scmp.lt.s32.totalorder %s2896_s13, %s2397_s7 }
  0xbd   : > { %p2394_p4 = pnand %p2392_p0, %p3269_p3  ;;  %p2400_p2 = scmp.lt.s32.totalorder %s2398_s11, %s2391_s10 }
  0xbf   : > { %p2395_p10 = pneg %p2394_p4  ;;  %p2401_p1 = por %p2400_p2, %p2399_p13 }
  0xc1   : > { %p2402_p12 = pnand %p2401_p1, %p2395_p10 }
  0xc3   : > { %2405 = shalt.err (!%p2402_p12)
}
  0xc4   : > { %p3270_p6 = scmp.ne.s32.totalorder %s3261_s17, 0  ;;  %s483_s18 = scalar_lea.vmem [#allocation7], %s2802_s15 }
  0xc5   : > { %s490_s26 = sshll.u32 %s483_s18, 4  ;;  %s2406_s3 = scalar_lea.hbm %s2902_s12, 128  ;;  %s491_s26 = int_to_ptr.vmem [resolvable:$true] %s490_s26 }
  0xc6   : > { %2130 = dma.hbm_to_vmem [thread:$0]  (!%p3270_p6), %s2893_s24, 128, %s2896_s13, %s443_s1  }
  0xc7   : > { %p2407_p8 = scmp.ne.s32.totalorder %s2902_s12, %s2406_s3  ;;  %s2411_s30 = scalar_lea.hbm %s3199_s2, 256 }
  0xc8   : > { %p2412_p11 = scmp.lt.u32.totalorder %s2902_s12, %s3199_s2  ;;  %p2413_p7 = scmp.lt.u32.totalorder %s2411_s30, %s2406_s3 }
  0xc9   : > { %p2409_p9 = pnand %p2407_p8, %p3269_p3  ;;  %p2415_p4 = scmp.lt.u32.totalorder %s2406_s3, %s2902_s12 }
  0xca   : > { %p2414_p0 = por %p2413_p7, %p2412_p11 }
  0xcb   : > { %p2410_p5 = pneg %p2409_p9 }
  0xcc   : > { %p2416_p10 = por %p2415_p4, %p2414_p0 }
  0xce   : > { %p2417_p13 = pnand %p2416_p10, %p2410_p5 }
  0xd0   : > { %2420 = shalt.err (!%p2417_p13)
}
  0xd1   : > { %s2421_s15 = scalar_lea.vmem %s491_s26, 128  ;;  %s2572_s24 = smov [#allocation7]  }
  0xd2   : > { %p2422_p2 = scmp.ne.s32.totalorder %s491_s26, %s2421_s15  ;;  %s2426_s13 = sshll.u32 %s2572_s24, 4  ;;  %s2427_s13 = int_to_ptr.vmem [resolvable:$false] %s2426_s13 }
  0xd3   : > { %s2428_s1 = scalar_lea.vmem %s2427_s13, 256  ;;  %p2429_p8 = scmp.lt.s32.totalorder %s491_s26, %s2427_s13 }
  0xd4   : > { %p2424_p1 = pnand %p2422_p2, %p3269_p3  ;;  %p2430_p9 = scmp.lt.s32.totalorder %s2428_s1, %s2421_s15 }
  0xd6   : > { %p2425_p12 = pneg %p2424_p1  ;;  %p2431_p6 = por %p2430_p9, %p2429_p8 }
  0xd8   : > { %p2432_p7 = pnand %p2431_p6, %p2425_p12 }
  0xda   : > { %2435 = shalt.err (!%p2432_p7)
}
  0xdb   : > { %p3271_p11 = scmp.ne.s32.totalorder %s3261_s17, 0  ;;  %p3272_p5 = scmp.ne.s32.totalorder %s3248_s28, 0 }
  0xdc   : > { %s2949_s25 = sand.u32 (!%p3272_p5), 1, %s2546_s22   ;;  %p3273_p3 = scmp.ne.s32.totalorder (!%p3272_p5), %s3255_s20, 0 }
  0xdd   : > { %2136 = dma.hbm_to_vmem [thread:$0]  (!%p3271_p11), %s2902_s12, 128, %s491_s26, %s2820_s19  }
  0xde   : > { %499 = sbr.rel (%p3272_p5) target bundleno = 2155 (0x86b), region = 64  ;;  %s2952_s10 = sshll.u32 (!%p3272_p5), %s2949_s25, 3 }
  0xdf   : > { %s502_s14 = scalar_lea.sflag (!%p3272_p5), [#allocation3], %s2949_s25  ;;  %s505_s7 = scalar_lea.vmem (!%p3272_p5), [#allocation2], %s2952_s10 }
  0xe5   : > { %2517 = dma.done.wait (%p3273_p3), %s502_s14, 128  }
  0xe6   : > { %2519 = vsyncadd (%p3273_p3), %s502_s14, 4294967168  ;;  %s510_s28 = sand.u32 1, %s2681_s27   ;;  %s514_s19 = scalar_lea.vmem [#allocation5], %s2952_s10 }
  0xe7   : > { %s511_s17 = scalar_lea.sflag [#allocation6], %s510_s28 }
  0xe8   : > { %2521 = dma.done.wait (%p3273_p3), %s511_s17, 256  }
  0xe9   : > { %2523 = vsyncadd (%p3273_p3), %s511_s17, 4294967040  ;;  %s523_s12 = scalar_lea.vmem [#allocation7], %s2952_s10  ;;  %p3274_p6 = scmp.eq.s32.totalorder %s2681_s27, 0 }
  0xeb   : > { %2525 = dma.done.wait (%p3274_p6), [#allocation9], 1024   ;;  %p3275_p0 = pmov %p3274_p6 }
  0xed   : > { %2527 = vsyncadd (%p3275_p0), [#allocation9], 4294966272  ;;  %p3276_p4 = pmov %p3275_p0 }
  0xee   : > { %p3277_p10 = pmov %p3275_p0 }
  0xef   : > { %2529 = dma.done.wait (%p3276_p4), [#allocation12], 528  }
  0xf0   : > { %2531 = vsyncadd (%p3277_p10), [#allocation12], 4294966768  ;;  %v2573_v0 = vmov 0.0|0.0   ;;  %vm2574_vm0 = vmmov 0   ;;  %v2575_v1 = vmov 0.0   ;;  %v606_v2 = vld [vmem:[#allocation10] sm:$0xff] }
  0xf1   : > { %2070 = vmatprep.subr.bf16.mxu1 %v2573_v0  ;;  %2064 = vmatprep.subr.bf16.mxu0 %v2573_v0  ;;  %v607_v3 = vld [vmem:[#allocation10 + $0x8] sm:$0xff]  ;;  %v601_v4 = vld [vmem:[#allocation8] sm:$0xff]  ;;  %v608_v7 = vld [vmem:[#allocation10 + $0x10] sm:$0xff]  ;;  %vm632_vm1 = vcmask 261120   ;;  %vm864_vm2 = vcmask 64512   ;;  %s2576_s26 = smov 120  }
  0xf2   : > { %1999 = vmatprep.mubr.msk.f32.mxu1 %vm2574_vm0, %v2575_v1  ;;  %1988 = vmatprep.mubr.msk.f32.mxu0 %vm2574_vm0, %v2575_v1  ;;  %v2071_v5 = vpack.c.bf16 %v607_v3, %v606_v2  ;;  %v602_v6 = vld [vmem:[#allocation8 + $0x8] sm:$0xff]  ;;  %v609_v8 = vld [vmem:[#allocation10 + $0x18] sm:$0xff]  ;;  %v603_v10 = vld [vmem:[#allocation8 + $0x10] sm:$0xff]  ;;  %s2577_s3 = smov 112   ;;  %s2578_s21 = smov 104   ;;  %vm1541_vm3 = vcmask 130048  }
  0xf3   : > { %v2065_v9 = vpack.c.bf16 %v602_v6, %v601_v4  ;;  %v604_v11 = vld [vmem:[#allocation8 + $0x18] sm:$0xff]  ;;  %v2074_v12 = vpack.c.bf16 %v609_v8, %v608_v7  ;;  %v597_v14 = vld [vmem:[%s514_s19] sm:$0xff]  ;;  %v1915_v16 = vld [vmem:[%s3203_s6] ss:$0 sm:$0xff]  ;;  %s1912_s16 = sshll.u32 %s2949_s25, 5  ;;  %s3278_s15 = sld [smem:[#allocation34_spill]] }
  0xf4   : > { %2072 = vmatpush3.bf16.msra.mxu1 %v2071_v5  ;;  %v2068_v13 = vpack.c.bf16 %v604_v11, %v603_v10  ;;  %v596_v15 = vld [vmem:[%s505_s7] sm:$0xff]  ;;  %v611_v24 = vld [vmem:[#allocation11] sm:$0xff]  ;;  %v612_v25 = vld [vmem:[#allocation11 + $0x8] sm:$0xff]  ;;  %s3036_s30 = scalar_lea.vmem [#allocation15], %s1912_s16  ;;  %s3091_s17 = scalar_lea.vmem [#allocation14], %s2952_s10  ;;  %vm1543_vm4 = vcmask 195584  }
  0xf5   : > { %2066 = vmatpush3.bf16.msra.mxu0 %v2065_v9  ;;  %2073 = vmatprep.subr.bf16.mxu1 %v2573_v0  ;;  %v1913_v17 = vld [vmem:[%s3201_s4] ss:$0 sm:$0xff]  ;;  %v2077_v27 = vpack.c.bf16 %v612_v25, %v611_v24  ;;  %v614_v28 = vld [vmem:[#allocation11 + $0x18] sm:$0xff]  ;;  %v1917_v39 = vld [vmem:[#allocation13] ss:$0 sm:$0xff]  ;;  %1622 = vst.msk [vmem:[%s3091_s17] sm:$0xff] %vm632_vm1, %v2575_v1 }
  0xf6   : > { %2067 = vmatprep.subr.bf16.mxu0 %v2573_v0  ;;  %v613_v26 = vld [vmem:[#allocation11 + $0x10] sm:$0xff]  ;;  %s2579_s19 = smov 8   ;;  %s3279_s27 = sld [smem:[#allocation24_spill]] }
  0xf7   : > { %v2080_v29 = vpack.c.bf16 %v614_v28, %v613_v26  ;;  %v598_v30 = vld [vmem:[%s523_s12] sm:$0xff]  ;;  %s2580_s12 = smov 16   ;;  %s2581_s20 = smov 24  }
  0xf8   : > { %2075 = vmatpush3.bf16.msra.mxu1 %v2074_v12  ;;  %s3280_s10 = sld [smem:[#allocation28_spill]]  ;;  %s1675_s18 = sshll.u32 %s3036_s30, 4  ;;  %s3107_s18 = int_to_ptr.vmem [resolvable:$true] %s1675_s18 }
  0xf9   : > { %2069 = vmatpush3.bf16.msra.mxu0 %v2068_v13  ;;  %2013 = vmatprep.subr.mxu1 %v2575_v1  ;;  %v616_v28 = vld [vmem:[%s3278_s15] sm:$0xff]  ;;  %s1645_s29 = scalar_lea.sflag [#allocation16], %s2949_s25  ;;  %s2436_s24 = scalar_lea.vmem %s3107_s18, 512 }
  0xfa   : > { %2076 = vmatprep.subr.bf16.mxu0 %v2573_v0  ;;  %p2437_p13 = scmp.ne.s32.totalorder %s3107_s18, %s2436_s24  ;;  %s2582_s13 = smov [#allocation15]  }
  0xfb   : > { %2000 = vmatmul.mubr.msk.f32.vlgmr.msra.gmra.mrb[0].mxu1 %vm632_vm1, %v597_v14  ;;  %s2440_s1 = sshll.u32 %s2582_s13, 4  ;;  %s2441_s1 = int_to_ptr.vmem [resolvable:$false] %s2440_s1 }
  0xfc   : > { %1989 = vmatmul.mubr.msk.f32.vlgmr.msra.gmra.mrb[0].mxu0 %vm632_vm1, %v596_v15  ;;  %2015 = vmatprep.mubr.msk.f32.mxu1 %vm2574_vm0, %v2575_v1  ;;  %s1943_s11 = sshll.u32 %s3279_s27, 9  ;;  %p2443_p8 = scmp.lt.s32.totalorder %s3107_s18, %s2441_s1 }
  0xfd   : > { %2010 = vmatprep.mubr.msk.f32.mxu0 %vm2574_vm0, %v2575_v1  ;;  %2078 = vmatpush3.bf16.msra.mxu0 %v2077_v27 }
  0xfe   : > { %2079 = vmatprep.subr.bf16.mxu0 %v2573_v0  ;;  %p3283_p2 = scmp.ne.s32.totalorder %s3280_s10, 0 }
 0x100   : > { %p2438_p1 = pnand %p2437_p13, %p3283_p2 }
 0x101   : > { %2081 = vmatpush3.bf16.msra.mxu0 %v2080_v29  ;;  %v617_v29 = vld [vmem:[%s3278_s15 + $0x8] sm:$0xff] }
 0x102   : > { %2033 = vmatprep.subr.mxu0 %v2575_v1  ;;  %p2439_p12 = pneg %p2438_p1 }
 0x104   : > { %2011 = vmatmul.mubr.msk.f32.vlgmr.msra.gmra.mrb[2].mxu0 %vm632_vm1, %v598_v30  ;;  %v2083_v30 = vpack.c.bf16 %v617_v29, %v616_v28 }
 0x105   : > { %2035 = vmatprep.mubr.msk.f32.mxu0 %vm2574_vm0, %v2575_v1 }
 0x1ce   : > { %v781_v18 = vpop.f32.mrb[0].mxu1 }
 0x1cf   : > { %v782_v19 = vadd.f32 %v1915_v16, %v781_v18  ;;  %v2001_v20 = vpop.f32.mrb[1].mxu1  ;;  %v702_v21 = vpop.f32.mrb[0].mxu0 }
 0x1d0   : > { %v703_v22 = vadd.f32 %v1913_v17, %v702_v21  ;;  %v1990_v23 = vpop.f32.mrb[1].mxu0 }
 0x1d1   : > { %1028 = vrot.lane.b32.xlu1 %v782_v19, %s2576_s26  ;;  %2014 = vmatpush3.xpose.msk.msra.mxu1 %vm864_vm2, %v782_v19 }
 0x1d2   : > { %2018 = vmatprep.subr.mxu1 %v2575_v1 }
 0x1d4   : > { %2016 = vmatmul.mubr.msk.f32.vlgmr.msra.gmra.mrb[2].mxu1 %vm864_vm2, %v703_v22 }
 0x1d5   : > { %1026 = vrot.lane.b32.xlu1 %v703_v22, %s2576_s26  ;;  %2020 = vmatprep.mubr.msk.f32.mxu1 %vm2574_vm0, %v2575_v1 }
 0x1d7   : > { %v860_v40 = vpop.f32.mrb[2].mxu0 }
 0x1d8   : > { %v3020_v41 = vadd.f32 %v1917_v39, %v860_v40  ;;  %v2012_v42 = vpop.f32.mrb[3].mxu0 }
 0x1d9   : > { %1194 = vrot.lane.b32.xlu1 %v703_v22, %s2577_s3 }
 0x1da   : > { %2019 = vmatpush3.msra.mxu1 %v3020_v41 }
 0x1db   : > { %2023 = vmatprep.subr.mxu1 %v2575_v1 }
 0x1dd   : > { %1363 = vrot.lane.b32.xlu1 %v782_v19, %s2578_s21 }
 0x1e1   : > { %1361 = vrot.lane.b32.xlu1 %v703_v22, %s2578_s21 }
 0x243   : > { %v1029_v43 = vpop.permute.xlu1 %1028 }
 0x247   : > { %v1027_v44 = vpop.permute.xlu1 %1026 }
 0x24b   : > { %v1195_v45 = vpop.permute.xlu1 %1194 }
 0x24f   : > { %v1364_v48 = vpop.permute.xlu1 %1363 }
 0x253   : > { %v1362_v50 = vpop.permute.xlu1 %1361 }
 0x2a7   : > { %v937_v31 = vpop.f32.mrb[2].mxu1 }
 0x2a8   : > { %v2017_v32 = vpop.f32.mrb[3].mxu1  ;;  %v941_v33 = vsel %vm864_vm2, %v937_v31, -inf }
 0x2a9   : > { %942 = vmax.xlane.f32.xlu0 %v941_v33  ;;  %v619_v32 = vld [vmem:[%s3278_s15 + $0x18] sm:$0xff] }
 0x336   : > { %v943_v34 = vpop.xlane.xlu0 %942 }
 0x337   : > { %v944_v35 = vsub.f32 %v937_v31, %v943_v34  ;;  %v618_v31 = vld [vmem:[%s3278_s15 + $0x10] sm:$0xff] }
 0x338   : > { %v2086_v33 = vpack.c.bf16 %v619_v32, %v618_v31 }
 0x339   : > { %v945_v36 = vmul.f32 1.442695, %v944_v35 }
 0x33b   : > { %2218 = vpow2.f32 %v945_v36 }
 0x345   : > { %v2219_v37 = vpop.eup %2218 }
 0x346   : > { %v947_v38 = vsel %vm864_vm2, %v2219_v37, 0.0 }
 0x347   : > { %948 = vadd.xlane.f32.xlu0 %v947_v38 }
 0x35d   : > { %1196 = vrot.lane.b32.xlu0 %v782_v19, %s2577_s3 }
 0x3d4   : > { %v949_v46 = vpop.xlane.xlu0 %948 }
 0x3d5   : > { %2220 = vrcp.f32 %v949_v46 }
 0x3d8   : > { %v1197_v47 = vpop.permute.xlu0 %1196 }
 0x3d9   : > { %2034 = vmatpush3.xpose.msk.msra.mxu0 %vm864_vm2, %v1197_v47 }
 0x3da   : > { %2043 = vmatprep.subr.mxu0 %v2575_v1 }
 0x3dc   : > { %2036 = vmatmul.mubr.msk.f32.vlgmr.msra.gmra.mrb[4].mxu0 %vm864_vm2, %v1195_v45 }
 0x3dd   : > { %2044 = vmatpush3.xpose.msk.msra.mxu0 %vm864_vm2, %v1364_v48  ;;  %2045 = vmatprep.mubr.msk.f32.mxu0 %vm2574_vm0, %v2575_v1 }
 0x3de   : > { %2082 = vmatprep.subr.bf16.mxu0 %v2573_v0 }
 0x3df   : > { %v2221_v49 = vpop.eup %2220 }
 0x3e0   : > { %v951_v51 = vmul.f32 %v2221_v49, %v2219_v37  ;;  %2046 = vmatmul.mubr.msk.f32.vlgmr.msra.gmra.mrb[6].mxu0 %vm864_vm2, %v1362_v50 }
 0x3e1   : > { %2061 = vmatprep.mubr.msk.f32.mxu0 %vm2574_vm0, %v2575_v1  ;;  %2084 = vmatpush3.bf16.msra.mxu0 %v2083_v30 }
 0x3e2   : > { %952 = vst.msk [vmem:[%s3036_s30] sm:$0xff] %vm864_vm2, %v951_v51  ;;  %2021 = vmatmul.mubr.msk.f32.vlgmr.msra.gmra.mrb[4].mxu1 %vm864_vm2, %v951_v51  ;;  %2085 = vmatprep.subr.bf16.mxu0 %v2573_v0 }
 0x3e3   : > { %2024 = vmatpush3.xpose.msk.msra.mxu1 %vm864_vm2, %v1029_v43  ;;  %2025 = vmatprep.mubr.msk.f32.mxu1 %vm2574_vm0, %v2575_v1 }
 0x3e4   : > { %2028 = vmatprep.subr.mxu1 %v2575_v1 }
 0x3e5   : > { %2087 = vmatpush3.bf16.msra.mxu0 %v2086_v33 }
 0x3e6   : > { %2026 = vmatmul.mubr.msk.f32.vlgmr.msra.gmra.mrb[6].mxu1 %vm864_vm2, %v1027_v44 }
 0x3e7   : > { %2030 = vmatprep.mubr.msk.f32.mxu1 %vm2574_vm0, %v2575_v1 }
 0x4af   : > { %v1268_v52 = vpop.f32.mrb[4].mxu0 }
 0x4b0   : > { %v2037_v53 = vpop.f32.mrb[5].mxu0  ;;  %v1272_v54 = vsel %vm864_vm2, %v1268_v52, -inf }
 0x4b1   : > { %1273 = vmax.xlane.f32.xlu0 %v1272_v54 }
 0x4b3   : > { %v1435_v55 = vpop.f32.mrb[6].mxu0 }
 0x4b4   : > { %v2047_v56 = vpop.f32.mrb[7].mxu0  ;;  %v1439_v62 = vsel %vm864_vm2, %v1435_v55, -inf }
 0x4b5   : > { %v3049_v57 = vpop.f32.mrb[4].mxu1 }
 0x4b6   : > { %v2022_v58 = vpop.f32.mrb[5].mxu1 }
 0x4b9   : > { %v1100_v59 = vpop.f32.mrb[6].mxu1 }
 0x4ba   : > { %v2027_v60 = vpop.f32.mrb[7].mxu1  ;;  %v1104_v61 = vsel %vm864_vm2, %v1100_v59, -inf }
 0x4bb   : > { %1105 = vmax.xlane.f32.xlu1 %v1104_v61 }
 0x4bf   : > { %1440 = vmax.xlane.f32.xlu1 %v1439_v62 }
 0x53e   : > { %v1274_v63 = vpop.xlane.xlu0 %1273 }
 0x53f   : > { %v1275_v2 = vsub.f32 %v1268_v52, %v1274_v63 }
 0x541   : > { %v1276_v3 = vmul.f32 1.442695, %v1275_v2 }
 0x543   : > { %2222 = vpow2.f32 %v1276_v3 }
 0x548   : > { %v1106_v4 = vpop.xlane.xlu1 %1105 }
 0x549   : > { %v1107_v12 = vsub.f32 %v1100_v59, %v1106_v4 }
 0x54b   : > { %v1108_v13 = vmul.f32 1.442695, %v1107_v12 }
 0x54c   : > { %v1441_v5 = vpop.xlane.xlu1 %1440 }
 0x54d   : > { %v2223_v6 = vpop.eup %2222  ;;  %v1442_v7 = vsub.f32 %v1435_v55, %v1441_v5 }
 0x54e   : > { %v1278_v8 = vsel %vm864_vm2, %v2223_v6, 0.0 }
 0x54f   : > { %v1443_v9 = vmul.f32 1.442695, %v1442_v7  ;;  %1279 = vadd.xlane.f32.xlu0 %v1278_v8 }
 0x551   : > { %2224 = vpow2.f32 %v1443_v9 }
 0x552   : > { %2226 = vpow2.f32 %v1108_v13 }
 0x55b   : > { %v2225_v10 = vpop.eup %2224 }
 0x55c   : > { %v1445_v11 = vsel %vm864_vm2, %v2225_v10, 0.0  ;;  %v2227_v14 = vpop.eup %2226 }
 0x55d   : > { %1446 = vadd.xlane.f32.xlu1 %v1445_v11  ;;  %v1110_v15 = vsel %vm864_vm2, %v2227_v14, 0.0 }
 0x565   : > { %1118 = vrot.lane.b32.xlu0 %v3020_v41, %s2576_s26 }
 0x56e   : > { %1285 = vrot.lane.b32.xlu1 %v3020_v41, %s2577_s3 }
 0x592   : > { %1111 = vadd.xlane.f32.xlu1 %v1110_v15 }
 0x5a3   : > { %1452 = vrot.lane.b32.xlu1 %v3020_v41, %s2578_s21  ;;  %s3281_s21 = sld [smem:[#allocation37_spill]] }
 0x5a9   : > { %s3282_s16 = smov %s3281_s21  ;;  %s3105_s9 = scalar_lea.hbm %s3281_s21, %s1943_s11 }
 0x5dc   : > { %v1280_v16 = vpop.xlane.xlu0 %1279 }
 0x5dd   : > { %2228 = vrcp.f32 %v1280_v16 }
 0x5e0   : > { %v1119_v17 = vpop.permute.xlu0 %1118 }
 0x5e1   : > { %2029 = vmatpush3.msra.mxu1 %v1119_v17 }
 0x5e2   : > { %2038 = vmatprep.subr.mxu1 %v2575_v1 }
 0x5e7   : > { %v2229_v18 = vpop.eup %2228 }
 0x5e8   : > { %v1282_v19 = vmul.f32 %v2229_v18, %v2223_v6 }
 0x5ea   : > { %1928 = vst.msk [vmem:[%s3036_s30 + $0x10] sm:$0xff] %vm864_vm2, %v1282_v19  ;;  %v1447_v20 = vpop.xlane.xlu1 %1446 }
 0x5eb   : > { %2230 = vrcp.f32 %v1447_v20 }
 0x5ee   : > { %v1286_v23 = vpop.permute.xlu1 %1285 }
 0x5f5   : > { %v2231_v21 = vpop.eup %2230 }
 0x5f6   : > { %v1449_v22 = vmul.f32 %v2231_v21, %v2225_v10 }
 0x5f8   : > { %1932 = vst.msk [vmem:[%s3036_s30 + $0x18] sm:$0xff] %vm864_vm2, %v1449_v22 }
 0x61f   : > { %v1112_v24 = vpop.xlane.xlu1 %1111 }
 0x620   : > { %2232 = vrcp.f32 %v1112_v24 }
 0x623   : > { %v1453_v27 = vpop.permute.xlu1 %1452 }
 0x62a   : > { %v2233_v25 = vpop.eup %2232 }
 0x62b   : > { %v1114_v26 = vmul.f32 %v2233_v25, %v2227_v14 }
 0x62d   : > { %1924 = vst.msk [vmem:[%s3036_s30 + $0x8] sm:$0xff] %vm864_vm2, %v1114_v26  ;;  %2031 = vmatmul.mubr.msk.f32.vlgmr.msra.gmra.mrb[8].mxu1 %vm864_vm2, %v1114_v26  ;;  %s2442_s30 = scalar_lea.vmem %s2441_s1, 1024 }
 0x62e   : > { %2039 = vmatpush3.msra.mxu1 %v1286_v23  ;;  %2040 = vmatprep.mubr.msk.f32.mxu1 %vm2574_vm0, %v2575_v1  ;;  %p2444_p9 = scmp.lt.s32.totalorder %s2442_s30, %s2436_s24 }
 0x62f   : > { %2048 = vmatprep.subr.mxu1 %v2575_v1 }
 0x630   : > { %p2445_p7 = por %p2444_p9, %p2443_p8 }
 0x631   : > { %2041 = vmatmul.mubr.msk.f32.vlgmr.msra.gmra.mrb[10].mxu1 %vm864_vm2, %v1282_v19 }
 0x632   : > { %2049 = vmatpush3.msra.mxu1 %v1453_v27  ;;  %2050 = vmatprep.mubr.msk.f32.mxu1 %vm2574_vm0, %v2575_v1  ;;  %p2446_p11 = pnand %p2445_p7, %p2439_p12 }
 0x635   : > { %2051 = vmatmul.mubr.msk.f32.vlgmr.msra.gmra.mrb[12].mxu1 %vm864_vm2, %v1449_v22 }
 0x700   : > { %v1190_v34 = vpop.f32.mrb[8].mxu1 }
 0x701   : > { %1529 = vrot.lane.b32.xlu0 %v1190_v34, %s2579_s19  ;;  %v2032_v0 = vpop.f32.mrb[9].mxu1 }
 0x704   : > { %v1357_v35 = vpop.f32.mrb[10].mxu1 }
 0x705   : > { %1533 = vrot.lane.b32.xlu1 %v1357_v35, %s2580_s12  ;;  %v2042_v36 = vpop.f32.mrb[11].mxu1 }
 0x708   : > { %v1524_v37 = vpop.f32.mrb[12].mxu1 }
 0x709   : > { %1537 = vrot.lane.b32.xlu0 %v1524_v37, %s2581_s20  ;;  %v2052_v38 = vpop.f32.mrb[13].mxu1 }
 0x773   : > { %v1530_v39 = vpop.permute.xlu0 %1529 }
 0x774   : > { %v1540_v40 = vsel %vm864_vm2, %v3049_v57, %v1530_v39 }
 0x777   : > { %v1534_v1 = vpop.permute.xlu1 %1533 }
 0x778   : > { %v1542_v41 = vsel %vm1541_vm3, %v1540_v40, %v1534_v1 }
 0x77b   : > { %v1538_v42 = vpop.permute.xlu0 %1537 }
 0x77c   : > { %v1544_v43 = vsel %vm1543_vm4, %v1542_v41, %v1538_v42 }
 0x77d   : > { %2062 = vmatmul.mubr.msk.f32.vlgmr.msra.gmra.mrb[8].mxu0 %vm632_vm1, %v1544_v43 }
 0x77e   : > { %2449 = shalt.err (!%p2446_p11)
}
 0x77f   : > { %s2450_s14 = scalar_lea.hbm %s3105_s9, 512  ;;  %s2454_s12 = scalar_lea.hbm %s3282_s16, 1024 }
 0x780   : > { %p2451_p5 = scmp.ne.s32.totalorder %s3105_s9, %s2450_s14  ;;  %p2455_p0 = scmp.lt.u32.totalorder %s3105_s9, %s3282_s16 }
 0x781   : > { %p2456_p4 = scmp.lt.u32.totalorder %s2454_s12, %s2450_s14  ;;  %p2458_p13 = scmp.lt.u32.totalorder %s2450_s14, %s3105_s9 }
 0x782   : > { %p2452_p3 = pnand %p2451_p5, %p3283_p2 }
 0x783   : > { %p2457_p10 = por %p2456_p4, %p2455_p0 }
 0x784   : > { %p2453_p6 = pneg %p2452_p3 }
 0x785   : > { %p2459_p1 = por %p2458_p13, %p2457_p10 }
 0x787   : > { %p2460_p12 = pnand %p2459_p1, %p2453_p6 }
 0x789   : > { %2463 = shalt.err (!%p2460_p12)
}
 0x78a   : > { %s2583_s26 = smov 128   ;;  %v1623_v44 = vld [vmem:[%s3091_s17] sm:$0xff]  ;;  %s3284_s24 = sld [smem:[#allocation35_spill]] }
 0x78b   : > { %2111 = dma.vmem_to_hbm [thread:$0]  (%p3283_p2), %s3107_s18, 512, %s3105_s9, %s1645_s29, %s2583_s26, %s2583_s26, %s2579_s19  }
 0x78c   : > { %s1938_s13 = sshll.u32 %s3279_s27, 7  ;;  %s1659_s1 = sshll.u32 %s3091_s17, 4  ;;  %s3148_s1 = int_to_ptr.vmem [resolvable:$true] %s1659_s1 }
 0x78d   : > { %s3285_s7 = sld [smem:[#allocation36_spill]]  ;;  %s1640_s19 = scalar_lea.sflag [#allocation4], %s2949_s25 }
 0x78e   : > { %s2464_s18 = scalar_lea.vmem %s3148_s1, 128  ;;  %s2584_s27 = smov [#allocation14]  }
 0x78f   : > { %p2465_p8 = scmp.ne.s32.totalorder %s3148_s1, %s2464_s18  ;;  %s2468_s9 = sshll.u32 %s2584_s27, 4  ;;  %s2469_s9 = int_to_ptr.vmem [resolvable:$false] %s2468_s9 }
 0x790   : > { %v1935_v48 = vld [vmem:[%s3284_s24] ss:$0 sm:$0xff]  ;;  %s2470_s29 = scalar_lea.vmem %s2469_s9, 256  ;;  %p2471_p11 = scmp.lt.s32.totalorder %s3148_s1, %s2469_s9 }
 0x791   : > { %p2466_p9 = pnand %p2465_p8, %p3283_p2  ;;  %p2472_p5 = scmp.lt.s32.totalorder %s2470_s29, %s2464_s18 }
 0x793   : > { %s3146_s28 = scalar_lea.hbm %s3285_s7, %s1938_s13  ;;  %p2467_p7 = pneg %p2466_p9 }
 0x794   : > { %p2473_p3 = por %p2472_p5, %p2471_p11 }
 0x796   : > { %p2474_p6 = pnand %p2473_p3, %p2467_p7 }
 0x850   : > { %v1614_v45 = vpop.f32.mrb[8].mxu0 }
 0x851   : > { %v1624_v46 = vadd.f32 %v1623_v44, %v1614_v45  ;;  %v2063_v47 = vpop.f32.mrb[9].mxu0 }
 0x853   : > { %1625 = vst.msk [vmem:[%s3091_s17] sm:$0xff] %vm632_vm1, %v1624_v46 }
 0x85a   : > { %v1629_v49 = vld [vmem:[%s3091_s17] sm:$0xff] }
 0x85b   : > { %v1637_v50 = vadd.f32 %v1935_v48, %v1629_v49 }
 0x85d   : > { %1638 = vst.msk [vmem:[%s3091_s17] sm:$0xff] %vm632_vm1, %v1637_v50 }
 0x85e   : > { %2477 = shalt.err (!%p2474_p6)
}
 0x85f   : > { %s2478_s25 = scalar_lea.hbm %s3146_s28, 128  ;;  %s2482_s20 = scalar_lea.hbm %s3285_s7, 256 }
 0x860   : > { %p2479_p0 = scmp.ne.s32.totalorder %s3146_s28, %s2478_s25  ;;  %p2483_p13 = scmp.lt.u32.totalorder %s3146_s28, %s3285_s7 }
 0x861   : > { %p2484_p1 = scmp.lt.u32.totalorder %s2482_s20, %s2478_s25  ;;  %p2486_p8 = scmp.lt.u32.totalorder %s2478_s25, %s3146_s28 }
 0x862   : > { %p2480_p4 = pnand %p2479_p0, %p3283_p2 }
 0x863   : > { %p2485_p12 = por %p2484_p1, %p2483_p13 }
 0x864   : > { %p2481_p10 = pneg %p2480_p4 }
 0x865   : > { %p2487_p9 = por %p2486_p8, %p2485_p12 }
 0x867   : > { %p2488_p7 = pnand %p2487_p9, %p2481_p10 }
 0x869   : > { %2491 = shalt.err (!%p2488_p7)
}
 0x86a   : > { %2110 = dma.vmem_to_hbm [thread:$0]  (%p3283_p2), %s3148_s1, 128, %s3146_s28, %s1640_s19  }
 0x86b PF: > { %s3286_s3 = sld [smem:[#allocation23_spill]]  ;;  %s3287_s21 = sld [smem:[#allocation30_spill]] }
 0x86c   : > { %s3288_s24 = sld [smem:[#allocation26_spill]] }
 0x871   : > { %s1690_s13 = sand.u32 1, %s3286_s3   ;;  %p3289_p11 = scmp.ne.s32.totalorder %s3287_s21, 0 }
 0x872   : > { %p3290_p5 = scmp.ge.s32.totalorder %s3288_s24, 2  ;;  %s1691_s30 = scalar_lea.sflag [#allocation4], %s1690_s13 }
 0x874   : > { %p2138_p3 = pnand %p3290_p5, %p3289_p11 }
 0x876   : > { %2533 = dma.done.wait (!%p2138_p3), %s1691_s30, 128  }
 0x877   : > { %2535 = vsyncadd (!%p2138_p3), %s1691_s30, 4294967168  ;;  %s1700_s14 = scalar_lea.sflag [#allocation16], %s1690_s13 }
 0x878   : > { %2537 = dma.done.wait (!%p2138_p3), %s1700_s14, 512  }
 0x879   : > { %2539 = vsyncadd (!%p2138_p3), %s1700_s14, 4294966784  ;;  %s37_s26 = sadd.s32 1, %s3288_s24   ;;  %s3291_s10 = sld [smem:[#allocation29_spill]] }
 0x87a   : > { %p34_p6 = scmp.ge.s32.totalorder %s37_s26, 4   ;;  %s3292_s24 = sld [smem:[#allocation25_spill]] }
 0x87b   : > { %s3293_s25 = sld [smem:[#allocation27_spill]]  ;;  %s3294_s21 = smov %s2546_s22 }
 0x87c   : > { %s3295_s22 = smov %s2550_s23  ;;  %36 = sbr.rel (!%p34_p6) target bundleno = 20 (0x14), region = 184 }
 0x87f   : > { %s3296_s23 = smov %s3291_s10 }
 0x883   :  { %1705 = vsyncpa [#allocation3], 1 }
 0x884   :  { %1707 = vsyncpa [#allocation3 + $0x1], 1 }
 0x885   :  { %1708 = vsyncpa [#allocation6], 1 }
 0x886   :  { %1710 = vsyncpa [#allocation6 + $0x1], 1 }
 0x887   :  { %1711 = vsyncpa [#allocation9], 1 }
 0x888   :  { %1712 = vsyncpa [#allocation12], 1 }
 0x889   :  { %1713 = vsyncpa [#allocation4], 1 }
 0x88a   :  { %1715 = vsyncpa [#allocation4 + $0x1], 1 }
 0x88b   :  { %1716 = vsyncpa [#allocation16], 1 }
 0x88c   :  { %1718 = vsyncpa [#allocation16 + $0x1], 1 }

</bundles_post_ra>
